<compile_context>
chip_gen: v7x
topology: tpu7x:2x2x1
jax: 0.10.0
libtpu: 0.0.40
codegen_flags: <defaults>
</compile_context>

<pallas_src>
import functools
import math

import jax
import jax.numpy as jnp
from jax.experimental import pallas as pl
from jax.experimental.pallas import tpu as pltpu


def _layer_norm(x, gamma, beta, eps=1e-5):
    mean = jnp.mean(x, axis=-1, keepdims=True)
    var = jnp.mean((x - mean) ** 2, axis=-1, keepdims=True)
    return (x - mean) * jax.lax.rsqrt(var + eps) * gamma + beta


def _tile(n, t):
    t = min(t, n)
    return t if n % t == 0 else math.gcd(n, t)


def _vmem_limit_bytes():
    # ~75% of physical VMEM (headroom for Pallas-internal buffers), capped at 100 MiB.
    # v5e/v6e: 128 MiB physical -> ~96 MiB limit; v7x: 64 MiB physical -> 48 MiB limit.
    try:
        cap = int(pltpu.get_tpu_info().vmem_capacity_bytes)
    except Exception:
        cap = 64 * 1024 * 1024  # conservative (v7x-sized) fallback
    return min((cap * 3) // 4, 100 * 1024 * 1024)


# --------------------------- pass 1: fused Q/K/V projection ---------------------------
def qkv_proj_kernel(x_ref, wq_ref, bq_ref, wk_ref, bk_ref, wv_ref, bv_ref,
                    q_ref, k_ref, v_ref, *, num_heads):
    H = num_heads
    E = x_ref.shape[2]
    Dh = E // H
    xb = x_ref[0].astype(jnp.bfloat16)                                        # [TS, E]
    # Full-depth [TS,E]x[E,E] MXU matmuls, f32 accumulate. wq/bq are pre-scaled by
    # 1/sqrt(Dh) on the host, so no in-kernel scaling of q is needed.
    q = jnp.dot(xb, wq_ref[...], preferred_element_type=jnp.float32) + bq_ref[0]
    k = jnp.dot(xb, wk_ref[...], preferred_element_type=jnp.float32) + bk_ref[0]
    v = jnp.dot(xb, wv_ref[...], preferred_element_type=jnp.float32) + bv_ref[0]
    # Write head-major so the attention pass never slices heads at lane offsets.
    for h in range(H):
        hs = h * Dh
        q_ref[0, h] = q[:, hs:hs + Dh].astype(jnp.bfloat16)
        k_ref[0, h] = k[:, hs:hs + Dh].astype(jnp.bfloat16)
        v_ref[0, h] = v[:, hs:hs + Dh].astype(jnp.bfloat16)


# ------------- pass 2: flash attention + O-projection + residual + LN1 ----------------
def attn_ln_kernel(x_ref, q_ref, k_ref, v_ref, mask_ref,
                   wo_ref, bo_ref, ln1_g_ref, ln1_b_ref,
                   o_ref,
                   m_scr, l_scr, acc_scr, ctx_scr, *, num_heads):
    H = num_heads
    TQ, Dh = q_ref.shape[2], q_ref.shape[3]
    TKV = k_ref.shape[2]

    qi = pl.program_id(1)
    ki = pl.program_id(2)
    # Last kv tile that intersects the causal region of this q tile.
    last_ki = (qi * TQ + TQ - 1) // TKV

    @pl.when(ki == 0)
    def _():
        m_scr[...] = jnp.full_like(m_scr, -jnp.inf)
        l_scr[...] = jnp.zeros_like(l_scr)
        acc_scr[...] = jnp.zeros_like(acc_scr)

    @pl.when(ki <= last_ki)                    # skip kv tiles fully above the diagonal
    def _():
        q = q_ref[0]                           # [H, TQ, Dh]  bf16 (pre-scaled)
        k = k_ref[0]                           # [H, TKV, Dh] bf16
        v = v_ref[0]                           # [H, TKV, Dh] bf16

        # All heads at once: batched QK^T on the MXU, f32 accumulate.
        s = jax.lax.dot_general(q, k, (((2,), (2,)), ((0,), (0,))),
                                preferred_element_type=jnp.float32)           # [H,TQ,TKV]

        # Padding mask (0 -> masked) AND causal mask, built once per (q,kv) tile.
        pad_keep = mask_ref[0, 0] != 0                                         # [1, TKV]
        q_idx = qi * TQ + jax.lax.broadcasted_iota(jnp.int32, (TQ, TKV), 0)
        k_idx = ki * TKV + jax.lax.broadcasted_iota(jnp.int32, (TQ, TKV), 1)
        keep = jnp.logical_and(pad_keep, k_idx <= q_idx)                       # [TQ, TKV]
        s = jnp.where(keep[None], s, -1e9)

        # Online softmax (vectorized over all heads).
        m_prev = m_scr[...]                                                    # [H, TQ, 1]
        m_new = jnp.maximum(m_prev, jnp.max(s, axis=-1, keepdims=True))
        alpha = jnp.exp(m_prev - m_new)
        p = jnp.exp(s - m_new)
        l_scr[...] = alpha * l_scr[...] + jnp.sum(p, axis=-1, keepdims=True)
        acc_scr[...] = alpha * acc_scr[...] + jax.lax.dot_general(
            p.astype(jnp.bfloat16), v, (((2,), (1,)), ((0,), (0,))),
            preferred_element_type=jnp.float32)                                # [H, TQ, Dh]
        m_scr[...] = m_new

    @pl.when(ki == last_ki)                    # finalize on the last *useful* kv tile
    def _():
        # NOTE: query rows whose entire causal key range is padding end up as a uniform
        # average over visited keys (finite, garbage) -- same caveat as the reference
        # review; such rows are discarded downstream.
        inv_l = pl.reciprocal(l_scr[...], approx=False)                        # [H, TQ, 1]
        ctx = (acc_scr[...] * inv_l).astype(jnp.bfloat16)                      # [H, TQ, Dh]
        # Re-assemble heads on the lane axis, then ONE full-depth output projection.
        for h in range(H):
            ctx_scr[:, h * Dh:(h + 1) * Dh] = ctx[h]
        attn = jnp.dot(ctx_scr[...], wo_ref[...],
                       preferred_element_type=jnp.float32) + bo_ref[0]
        x1 = _layer_norm(x_ref[0] + attn, ln1_g_ref[0], ln1_b_ref[0])
        o_ref[0] = x1.astype(o_ref.dtype)


# ------------------- pass 3: FFN + residual + LN2 (F axis streamed) -------------------
def ffn_ln_kernel(x1_ref, w1_ref, b1_ref, w2_ref, b2_ref, ln2_g_ref, ln2_b_ref,
                  o_ref, acc_ref):
    fi = pl.program_id(1)
    nf = pl.num_programs(1)

    @pl.when(fi == 0)
    def _():
        acc_ref[...] = jnp.zeros_like(acc_ref)

    x1 = x1_ref[...]                                                           # [TR, E] f32
    hblk = jnp.dot(x1.astype(jnp.bfloat16), w1_ref[...],
                   preferred_element_type=jnp.float32) + b1_ref[0]
    hblk = jnp.maximum(hblk, 0.0).astype(jnp.bfloat16)                         # ReLU
    acc_ref[...] += jnp.dot(hblk, w2_ref[...], preferred_element_type=jnp.float32)

    @pl.when(fi == nf - 1)
    def _():
        ff = acc_ref[...] + b2_ref[0]
        o_ref[...] = _layer_norm(x1 + ff, ln2_g_ref[0], ln2_b_ref[0]).astype(o_ref.dtype)


# --------------------------------- host-side wrapper ----------------------------------
def _decoder_block(x, mask, params, *, num_heads, seq_tile, q_tile, kv_tile,
                   f_tile, ffn_row_tile, single_buffer_weights):
    B, S, E = x.shape
    F = params["w1"].shape[1]
    H = num_heads
    assert E % H == 0, "emb_dim must be divisible by num_heads"
    Dh = E // H
    scale = 1.0 / math.sqrt(Dh)
    bf16 = jnp.bfloat16

    # bf16 MXU operands; fold the attention scale into the Q projection on the host.
    wq = (params["wq"] * scale).astype(bf16)
    bq = (params["bq"] * scale).astype(jnp.float32)
    wk = params["wk"].astype(bf16)
    wv = params["wv"].astype(bf16)
    wo = params["wo"].astype(bf16)
    w1 = params["w1"].astype(bf16)
    w2 = params["w2"].astype(bf16)

    vmem_limit = _vmem_limit_bytes()

    def const_spec(shape):
        index_map = lambda *_: (0,) * len(shape)
        if single_buffer_weights:
            # Constant-index blocks are DMA'd once; a single buffer halves their VMEM.
            return pl.BlockSpec(shape, index_map, pipeline_mode=pl.Buffered(1))
        return pl.BlockSpec(shape, index_map)

    # ---- pass 1: Q/K/V projection (each token projected exactly once) ----
    TS = _tile(S, seq_tile)
    q4, k4, v4 = pl.pallas_call(
        functools.partial(qkv_proj_kernel, num_heads=H),
        out_shape=[jax.ShapeDtypeStruct((B, H, S, Dh), bf16)] * 3,
        grid_spec=pltpu.PrefetchScalarGridSpec(
            num_scalar_prefetch=0,
            grid=(B, S // TS),
            in_specs=[
                pl.BlockSpec((1, TS, E), lambda b, si: (b, si, 0)),
                const_spec((E, E)), const_spec((1, E)),        # wq, bq (pre-scaled)
                const_spec((E, E)), const_spec((1, E)),        # wk, bk
                const_spec((E, E)), const_spec((1, E)),        # wv, bv
            ],
            out_specs=[pl.BlockSpec((1, H, TS, Dh), lambda b, si: (b, 0, si, 0))] * 3,
        ),
        compiler_params=pltpu.CompilerParams(
            dimension_semantics=("parallel", "parallel"),
            vmem_limit_bytes=vmem_limit),
    )(x, wq, bq, wk, params["bk"], wv, params["bv"])

    # ---- pass 2: flash attention + O-projection + residual + LN1 ----
    TQ = _tile(S, q_tile)
    TKV = _tile(S, kv_tile)
    NQ, NKV = S // TQ, S // TKV

    def kv_index(b, qi, ki):
        last = (qi * TQ + TQ - 1) // TKV               # last kv tile under the diagonal
        return (b, 0, jnp.minimum(ki, last), 0)        # clamp -> no DMA for dead tiles

    def mask_index(b, qi, ki):
        last = (qi * TQ + TQ - 1) // TKV
        return (b, 0, 0, jnp.minimum(ki, last))

    x1 = pl.pallas_call(
        functools.partial(attn_ln_kernel, num_heads=H),
        out_shape=jax.ShapeDtypeStruct((B, S, E), jnp.float32),
        grid_spec=pltpu.PrefetchScalarGridSpec(
            num_scalar_prefetch=0,
            grid=(B, NQ, NKV),
            in_specs=[
                pl.BlockSpec((1, TQ, E), lambda b, qi, ki: (b, qi, 0)),         # residual x
                pl.BlockSpec((1, H, TQ, Dh), lambda b, qi, ki: (b, 0, qi, 0)),  # Q
                pl.BlockSpec((1, H, TKV, Dh), kv_index),                        # K
                pl.BlockSpec((1, H, TKV, Dh), kv_index),                        # V
                pl.BlockSpec((1, 1, 1, TKV), mask_index),                       # padding mask
                const_spec((E, E)), const_spec((1, E)),                         # wo, bo
                const_spec((1, E)), const_spec((1, E)),                         # ln1 g, b
            ],
            out_specs=pl.BlockSpec((1, TQ, E), lambda b, qi, ki: (b, qi, 0)),
            scratch_shapes=[
                pltpu.VMEM((H, TQ, 1), jnp.float32),     # running max (per head)
                pltpu.VMEM((H, TQ, 1), jnp.float32),     # running denominator
                pltpu.VMEM((H, TQ, Dh), jnp.float32),    # running numerator
                pltpu.VMEM((TQ, E), bf16),               # assembled per-head contexts
            ]),
        compiler_params=pltpu.CompilerParams(
            dimension_semantics=("parallel", "parallel", "arbitrary"),
            vmem_limit_bytes=vmem_limit),
    )(x, q4, k4, v4, mask, wo, params["bo"], params["ln1_g"], params["ln1_b"])

    # ---- pass 3: FFN + residual + LN2, rows flattened, w1/w2 streamed over F ----
    BS = B * S
    TR = _tile(BS, ffn_row_tile)
    TF = _tile(F, f_tile)
    x1_flat = x1.reshape(BS, E)

    out_flat = pl.pallas_call(
        ffn_ln_kernel,
        out_shape=jax.ShapeDtypeStruct((BS, E), x.dtype),
        grid_spec=pltpu.PrefetchScalarGridSpec(
            num_scalar_prefetch=0,
            grid=(BS // TR, F // TF),
            in_specs=[
                pl.BlockSpec((TR, E), lambda r, fi: (r, 0)),        # x1 rows
                pl.BlockSpec((E, TF), lambda r, fi: (0, fi)),       # w1 slab (streamed)
                pl.BlockSpec((1, TF), lambda r, fi: (0, fi)),       # b1 slab
                pl.BlockSpec((TF, E), lambda r, fi: (fi, 0)),       # w2 slab (streamed)
                const_spec((1, E)),                                 # b2
                const_spec((1, E)), const_spec((1, E)),             # ln2 g, b
            ],
            out_specs=pl.BlockSpec((TR, E), lambda r, fi: (r, 0)),
            scratch_shapes=[pltpu.VMEM((TR, E), jnp.float32)]),
        compiler_params=pltpu.CompilerParams(
            dimension_semantics=("parallel", "arbitrary"),
            vmem_limit_bytes=vmem_limit),
    )(x1_flat, w1, params["b1"], w2, params["b2"], params["ln2_g"], params["ln2_b"])

    return out_flat.reshape(B, S, E)


def transformer_decoder_block(x, mask, params, *, num_heads,
                              seq_tile=256, q_tile=256, kv_tile=256,
                              f_tile=512, ffn_row_tile=512):
    kwargs = dict(num_heads=num_heads, seq_tile=seq_tile, q_tile=q_tile,
                  kv_tile=kv_tile, f_tile=f_tile, ffn_row_tile=ffn_row_tile)
    try:
        return _decoder_block(x, mask, params, single_buffer_weights=True, **kwargs)
    except Exception:
        # Fallback for jax versions without BlockSpec(pipeline_mode=pl.Buffered(1)):
        # identical semantics, default double-buffered weights (more VMEM).
        return _decoder_block(x, mask, params, single_buffer_weights=False, **kwargs)


# ------------------------------------ test harness ------------------------------------
def init_params(key, emb_dim, ff_multiplier):
    E, F = emb_dim, emb_dim * ff_multiplier
    keys = jax.random.split(key, 6)

    def lin(k, fan_in, shape):
        s = 1.0 / math.sqrt(fan_in)
        return jax.random.uniform(k, shape, jnp.float32, -s, s)

    return {
        "wq": lin(keys[0], E, (E, E)), "bq": jnp.zeros((1, E), jnp.float32),
        "wk": lin(keys[1], E, (E, E)), "bk": jnp.zeros((1, E), jnp.float32),
        "wv": lin(keys[2], E, (E, E)), "bv": jnp.zeros((1, E), jnp.float32),
        "wo": lin(keys[3], E, (E, E)), "bo": jnp.zeros((1, E), jnp.float32),
        "ln1_g": jnp.ones((1, E), jnp.float32), "ln1_b": jnp.zeros((1, E), jnp.float32),
        "w1": lin(keys[4], E, (E, F)), "b1": jnp.zeros((1, F), jnp.float32),
        "w2": lin(keys[5], F, (F, E)), "b2": jnp.zeros((1, E), jnp.float32),
        "ln2_g": jnp.ones((1, E), jnp.float32), "ln2_b": jnp.zeros((1, E), jnp.float32),
    }


def decoder_block_reference(x, mask, params, *, num_heads):
    """Pure-JAX f32 reference (same semantics, no Pallas)."""
    B, S, E = x.shape
    H = num_heads
    Dh = E // H
    q = x @ params["wq"] + params["bq"][0]
    k = x @ params["wk"] + params["bk"][0]
    v = x @ params["wv"] + params["bv"][0]
    qh = q.reshape(B, S, H, Dh).transpose(0, 2, 1, 3)
    kh = k.reshape(B, S, H, Dh).transpose(0, 2, 1, 3)
    vh = v.reshape(B, S, H, Dh).transpose(0, 2, 1, 3)
    s = jnp.einsum("bhqd,bhkd->bhqk", qh, kh) / math.sqrt(Dh)
    causal = jnp.tril(jnp.ones((S, S), bool))[None, None]
    keep = jnp.logical_and(mask != 0, causal)
    s = jnp.where(keep, s, -1e9)
    p = jax.nn.softmax(s, axis=-1)
    ctx = jnp.einsum("bhqk,bhkd->bhqd", p, vh).transpose(0, 2, 1, 3).reshape(B, S, E)
    attn = ctx @ params["wo"] + params["bo"][0]
    x1 = _layer_norm(x + attn, params["ln1_g"][0], params["ln1_b"][0])
    h1 = jnp.maximum(x1 @ params["w1"] + params["b1"][0], 0.0)
    ff = h1 @ params["w2"] + params["b2"][0]
    return _layer_norm(x1 + ff, params["ln2_g"][0], params["ln2_b"][0])


if __name__ == "__main__":
    B, S, E = 2, 8, 32
    num_heads = 4
    ff_multiplier = 4

    key = jax.random.PRNGKey(0)
    kx, kp = jax.random.split(key)

    x = jax.random.normal(kx, (B, S, E), dtype=jnp.float32)
    # padding mask [B, 1, 1, S]: 1 = keep, 0 = masked (last 2 tokens of batch 1 masked)
    mask = jnp.ones((B, 1, 1, S), dtype=jnp.float32)
    mask = mask.at[1, 0, 0, S - 2:].set(0.0)

    params = init_params(kp, E, ff_multiplier)

    out = transformer_decoder_block(x, mask, params, num_heads=num_heads)
    out = jax.block_until_ready(out)

    assert out.shape == (B, S, E)
    assert jnp.all(jnp.isfinite(out))

    ref = decoder_block_reference(x, mask, params, num_heads=num_heads)
    max_err = float(jnp.max(jnp.abs(out - ref)))
    assert jnp.allclose(out, ref, atol=1e-1, rtol=1e-1), max_err

    print("KERNEL_OK")
</pallas_src>

<mosaic_0001>
module attributes {stable_mosaic.version = 11 : i64} {
  func.func @qkv_proj_kernel(%arg0: i32, %arg1: i32, %arg2: memref<1x8x32xf32, #tpu.memory_space<vmem>>, %arg3: memref<32x32xbf16, #tpu.memory_space<vmem>>, %arg4: memref<1x32xf32, #tpu.memory_space<vmem>>, %arg5: memref<32x32xbf16, #tpu.memory_space<vmem>>, %arg6: memref<1x32xf32, #tpu.memory_space<vmem>>, %arg7: memref<32x32xbf16, #tpu.memory_space<vmem>>, %arg8: memref<1x32xf32, #tpu.memory_space<vmem>>, %arg9: memref<1x4x8x8xbf16, #tpu.memory_space<vmem>>, %arg10: memref<1x4x8x8xbf16, #tpu.memory_space<vmem>>, %arg11: memref<1x4x8x8xbf16, #tpu.memory_space<vmem>>) attributes {dimension_semantics = [#tpu.dimension_semantics<parallel>, #tpu.dimension_semantics<parallel>], iteration_bounds = array<i64: 2, 1>, scalar_prefetch = 0 : i64, scratch_operands = 0 : i64, tpu.core_type = #tpu.core_type<tc>, window_params = [{transform_indices = @transform_0, window_bounds = array<i64: 1, 8, 32>}, {pipeline_mode = #tpu.pipeline_mode<synchronous>, transform_indices = @transform_1, window_bounds = array<i64: 32, 32>}, {pipeline_mode = #tpu.pipeline_mode<synchronous>, transform_indices = @transform_2, window_bounds = array<i64: 1, 32>}, {pipeline_mode = #tpu.pipeline_mode<synchronous>, transform_indices = @transform_3, window_bounds = array<i64: 32, 32>}, {pipeline_mode = #tpu.pipeline_mode<synchronous>, transform_indices = @transform_4, window_bounds = array<i64: 1, 32>}, {pipeline_mode = #tpu.pipeline_mode<synchronous>, transform_indices = @transform_5, window_bounds = array<i64: 32, 32>}, {pipeline_mode = #tpu.pipeline_mode<synchronous>, transform_indices = @transform_6, window_bounds = array<i64: 1, 32>}, {transform_indices = @transform_7, window_bounds = array<i64: 1, 4, 8, 8>}, {transform_indices = @transform_8, window_bounds = array<i64: 1, 4, 8, 8>}, {transform_indices = @transform_9, window_bounds = array<i64: 1, 4, 8, 8>}]} {
    %c0 = arith.constant 0 : index
    %c0_0 = arith.constant 0 : index
    %c0_1 = arith.constant 0 : index
    %0 = vector.load %arg2[%c0, %c0_0, %c0_1] : memref<1x8x32xf32, #tpu.memory_space<vmem>>, vector<1x8x32xf32>
    %1 = vector.shape_cast %0 : vector<1x8x32xf32> to vector<8x32xf32>
    %2 = arith.truncf %1 : vector<8x32xf32> to vector<8x32xbf16>
    %c0_2 = arith.constant 0 : index
    %c0_3 = arith.constant 0 : index
    %3 = vector.load %arg3[%c0_2, %c0_3] : memref<32x32xbf16, #tpu.memory_space<vmem>>, vector<32x32xbf16>
    %cst = arith.constant dense<0.000000e+00> : vector<8x32xf32>
    %4 = tpu.matmul %2, %3, %cst {dimension_numbers = #tpu.dot_dimension_numbers<[1], [0], [0], [1], [0, 0, 1, 1], [], []>} : vector<8x32xbf16>, vector<32x32xbf16>, vector<8x32xf32> -> vector<8x32xf32>
    %c0_4 = arith.constant 0 : index
    %c0_5 = arith.constant 0 : index
    %5 = vector.load %arg4[%c0_4, %c0_5] : memref<1x32xf32, #tpu.memory_space<vmem>>, vector<1x32xf32>
    %6 = vector.shape_cast %5 : vector<1x32xf32> to vector<32xf32>
    %7 = vector.shape_cast %6 : vector<32xf32> to vector<1x32xf32>
    %8 = vector.broadcast %7 : vector<1x32xf32> to vector<8x32xf32>
    %9 = arith.addf %4, %8 : vector<8x32xf32>
    %c0_6 = arith.constant 0 : index
    %c0_7 = arith.constant 0 : index
    %10 = vector.load %arg5[%c0_6, %c0_7] : memref<32x32xbf16, #tpu.memory_space<vmem>>, vector<32x32xbf16>
    %cst_8 = arith.constant dense<0.000000e+00> : vector<8x32xf32>
    %11 = tpu.matmul %2, %10, %cst_8 {dimension_numbers = #tpu.dot_dimension_numbers<[1], [0], [0], [1], [0, 0, 1, 1], [], []>} : vector<8x32xbf16>, vector<32x32xbf16>, vector<8x32xf32> -> vector<8x32xf32>
    %c0_9 = arith.constant 0 : index
    %c0_10 = arith.constant 0 : index
    %12 = vector.load %arg6[%c0_9, %c0_10] : memref<1x32xf32, #tpu.memory_space<vmem>>, vector<1x32xf32>
    %13 = vector.shape_cast %12 : vector<1x32xf32> to vector<32xf32>
    %14 = vector.shape_cast %13 : vector<32xf32> to vector<1x32xf32>
    %15 = vector.broadcast %14 : vector<1x32xf32> to vector<8x32xf32>
    %16 = arith.addf %11, %15 : vector<8x32xf32>
    %c0_11 = arith.constant 0 : index
    %c0_12 = arith.constant 0 : index
    %17 = vector.load %arg7[%c0_11, %c0_12] : memref<32x32xbf16, #tpu.memory_space<vmem>>, vector<32x32xbf16>
    %cst_13 = arith.constant dense<0.000000e+00> : vector<8x32xf32>
    %18 = tpu.matmul %2, %17, %cst_13 {dimension_numbers = #tpu.dot_dimension_numbers<[1], [0], [0], [1], [0, 0, 1, 1], [], []>} : vector<8x32xbf16>, vector<32x32xbf16>, vector<8x32xf32> -> vector<8x32xf32>
    %c0_14 = arith.constant 0 : index
    %c0_15 = arith.constant 0 : index
    %19 = vector.load %arg8[%c0_14, %c0_15] : memref<1x32xf32, #tpu.memory_space<vmem>>, vector<1x32xf32>
    %20 = vector.shape_cast %19 : vector<1x32xf32> to vector<32xf32>
    %21 = vector.shape_cast %20 : vector<32xf32> to vector<1x32xf32>
    %22 = vector.broadcast %21 : vector<1x32xf32> to vector<8x32xf32>
    %23 = arith.addf %18, %22 : vector<8x32xf32>
    %24 = vector.extract_strided_slice %9 {offsets = [0, 0], sizes = [8, 8], strides = [1, 1]} : vector<8x32xf32> to vector<8x8xf32>
    %25 = arith.truncf %24 : vector<8x8xf32> to vector<8x8xbf16>
    %c0_16 = arith.constant 0 : index
    %c0_17 = arith.constant 0 : index
    %c0_18 = arith.constant 0 : index
    %c0_19 = arith.constant 0 : index
    %26 = vector.load %arg9[%c0_16, %c0_17, %c0_18, %c0_19] : memref<1x4x8x8xbf16, #tpu.memory_space<vmem>>, vector<1x1x8x8xbf16>
    %27 = vector.shape_cast %26 : vector<1x1x8x8xbf16> to vector<8x8xbf16>
    %28 = vector.shape_cast %25 : vector<8x8xbf16> to vector<1x1x8x8xbf16>
    tpu.vector_store %arg9[%c0_16, %c0_17, %c0_18, %c0_19], %28 {strides = array<i32>} : memref<1x4x8x8xbf16, #tpu.memory_space<vmem>>, vector<1x1x8x8xbf16>,
    %29 = vector.extract_strided_slice %16 {offsets = [0, 0], sizes = [8, 8], strides = [1, 1]} : vector<8x32xf32> to vector<8x8xf32>
    %30 = arith.truncf %29 : vector<8x8xf32> to vector<8x8xbf16>
    %c0_20 = arith.constant 0 : index
    %c0_21 = arith.constant 0 : index
    %c0_22 = arith.constant 0 : index
    %c0_23 = arith.constant 0 : index
    %31 = vector.load %arg10[%c0_20, %c0_21, %c0_22, %c0_23] : memref<1x4x8x8xbf16, #tpu.memory_space<vmem>>, vector<1x1x8x8xbf16>
    %32 = vector.shape_cast %31 : vector<1x1x8x8xbf16> to vector<8x8xbf16>
    %33 = vector.shape_cast %30 : vector<8x8xbf16> to vector<1x1x8x8xbf16>
    tpu.vector_store %arg10[%c0_20, %c0_21, %c0_22, %c0_23], %33 {strides = array<i32>} : memref<1x4x8x8xbf16, #tpu.memory_space<vmem>>, vector<1x1x8x8xbf16>,
    %34 = vector.extract_strided_slice %23 {offsets = [0, 0], sizes = [8, 8], strides = [1, 1]} : vector<8x32xf32> to vector<8x8xf32>
    %35 = arith.truncf %34 : vector<8x8xf32> to vector<8x8xbf16>
    %c0_24 = arith.constant 0 : index
    %c0_25 = arith.constant 0 : index
    %c0_26 = arith.constant 0 : index
    %c0_27 = arith.constant 0 : index
    %36 = vector.load %arg11[%c0_24, %c0_25, %c0_26, %c0_27] : memref<1x4x8x8xbf16, #tpu.memory_space<vmem>>, vector<1x1x8x8xbf16>
    %37 = vector.shape_cast %36 : vector<1x1x8x8xbf16> to vector<8x8xbf16>
    %38 = vector.shape_cast %35 : vector<8x8xbf16> to vector<1x1x8x8xbf16>
    tpu.vector_store %arg11[%c0_24, %c0_25, %c0_26, %c0_27], %38 {strides = array<i32>} : memref<1x4x8x8xbf16, #tpu.memory_space<vmem>>, vector<1x1x8x8xbf16>,
    %39 = vector.extract_strided_slice %9 {offsets = [0, 8], sizes = [8, 8], strides = [1, 1]} : vector<8x32xf32> to vector<8x8xf32>
    %40 = arith.truncf %39 : vector<8x8xf32> to vector<8x8xbf16>
    %c0_28 = arith.constant 0 : index
    %c1 = arith.constant 1 : index
    %c0_29 = arith.constant 0 : index
    %c0_30 = arith.constant 0 : index
    %41 = vector.load %arg9[%c0_28, %c1, %c0_29, %c0_30] : memref<1x4x8x8xbf16, #tpu.memory_space<vmem>>, vector<1x1x8x8xbf16>
    %42 = vector.shape_cast %41 : vector<1x1x8x8xbf16> to vector<8x8xbf16>
    %43 = vector.shape_cast %40 : vector<8x8xbf16> to vector<1x1x8x8xbf16>
    tpu.vector_store %arg9[%c0_28, %c1, %c0_29, %c0_30], %43 {strides = array<i32>} : memref<1x4x8x8xbf16, #tpu.memory_space<vmem>>, vector<1x1x8x8xbf16>,
    %44 = vector.extract_strided_slice %16 {offsets = [0, 8], sizes = [8, 8], strides = [1, 1]} : vector<8x32xf32> to vector<8x8xf32>
    %45 = arith.truncf %44 : vector<8x8xf32> to vector<8x8xbf16>
    %c0_31 = arith.constant 0 : index
    %c1_32 = arith.constant 1 : index
    %c0_33 = arith.constant 0 : index
    %c0_34 = arith.constant 0 : index
    %46 = vector.load %arg10[%c0_31, %c1_32, %c0_33, %c0_34] : memref<1x4x8x8xbf16, #tpu.memory_space<vmem>>, vector<1x1x8x8xbf16>
    %47 = vector.shape_cast %46 : vector<1x1x8x8xbf16> to vector<8x8xbf16>
    %48 = vector.shape_cast %45 : vector<8x8xbf16> to vector<1x1x8x8xbf16>
    tpu.vector_store %arg10[%c0_31, %c1_32, %c0_33, %c0_34], %48 {strides = array<i32>} : memref<1x4x8x8xbf16, #tpu.memory_space<vmem>>, vector<1x1x8x8xbf16>,
    %49 = vector.extract_strided_slice %23 {offsets = [0, 8], sizes = [8, 8], strides = [1, 1]} : vector<8x32xf32> to vector<8x8xf32>
    %50 = arith.truncf %49 : vector<8x8xf32> to vector<8x8xbf16>
    %c0_35 = arith.constant 0 : index
    %c1_36 = arith.constant 1 : index
    %c0_37 = arith.constant 0 : index
    %c0_38 = arith.constant 0 : index
    %51 = vector.load %arg11[%c0_35, %c1_36, %c0_37, %c0_38] : memref<1x4x8x8xbf16, #tpu.memory_space<vmem>>, vector<1x1x8x8xbf16>
    %52 = vector.shape_cast %51 : vector<1x1x8x8xbf16> to vector<8x8xbf16>
    %53 = vector.shape_cast %50 : vector<8x8xbf16> to vector<1x1x8x8xbf16>
    tpu.vector_store %arg11[%c0_35, %c1_36, %c0_37, %c0_38], %53 {strides = array<i32>} : memref<1x4x8x8xbf16, #tpu.memory_space<vmem>>, vector<1x1x8x8xbf16>,
    %54 = vector.extract_strided_slice %9 {offsets = [0, 16], sizes = [8, 8], strides = [1, 1]} : vector<8x32xf32> to vector<8x8xf32>
    %55 = arith.truncf %54 : vector<8x8xf32> to vector<8x8xbf16>
    %c0_39 = arith.constant 0 : index
    %c2 = arith.constant 2 : index
    %c0_40 = arith.constant 0 : index
    %c0_41 = arith.constant 0 : index
    %56 = vector.load %arg9[%c0_39, %c2, %c0_40, %c0_41] : memref<1x4x8x8xbf16, #tpu.memory_space<vmem>>, vector<1x1x8x8xbf16>
    %57 = vector.shape_cast %56 : vector<1x1x8x8xbf16> to vector<8x8xbf16>
    %58 = vector.shape_cast %55 : vector<8x8xbf16> to vector<1x1x8x8xbf16>
    tpu.vector_store %arg9[%c0_39, %c2, %c0_40, %c0_41], %58 {strides = array<i32>} : memref<1x4x8x8xbf16, #tpu.memory_space<vmem>>, vector<1x1x8x8xbf16>,
    %59 = vector.extract_strided_slice %16 {offsets = [0, 16], sizes = [8, 8], strides = [1, 1]} : vector<8x32xf32> to vector<8x8xf32>
    %60 = arith.truncf %59 : vector<8x8xf32> to vector<8x8xbf16>
    %c0_42 = arith.constant 0 : index
    %c2_43 = arith.constant 2 : index
    %c0_44 = arith.constant 0 : index
    %c0_45 = arith.constant 0 : index
    %61 = vector.load %arg10[%c0_42, %c2_43, %c0_44, %c0_45] : memref<1x4x8x8xbf16, #tpu.memory_space<vmem>>, vector<1x1x8x8xbf16>
    %62 = vector.shape_cast %61 : vector<1x1x8x8xbf16> to vector<8x8xbf16>
    %63 = vector.shape_cast %60 : vector<8x8xbf16> to vector<1x1x8x8xbf16>
    tpu.vector_store %arg10[%c0_42, %c2_43, %c0_44, %c0_45], %63 {strides = array<i32>} : memref<1x4x8x8xbf16, #tpu.memory_space<vmem>>, vector<1x1x8x8xbf16>,
    %64 = vector.extract_strided_slice %23 {offsets = [0, 16], sizes = [8, 8], strides = [1, 1]} : vector<8x32xf32> to vector<8x8xf32>
    %65 = arith.truncf %64 : vector<8x8xf32> to vector<8x8xbf16>
    %c0_46 = arith.constant 0 : index
    %c2_47 = arith.constant 2 : index
    %c0_48 = arith.constant 0 : index
    %c0_49 = arith.constant 0 : index
    %66 = vector.load %arg11[%c0_46, %c2_47, %c0_48, %c0_49] : memref<1x4x8x8xbf16, #tpu.memory_space<vmem>>, vector<1x1x8x8xbf16>
    %67 = vector.shape_cast %66 : vector<1x1x8x8xbf16> to vector<8x8xbf16>
    %68 = vector.shape_cast %65 : vector<8x8xbf16> to vector<1x1x8x8xbf16>
    tpu.vector_store %arg11[%c0_46, %c2_47, %c0_48, %c0_49], %68 {strides = array<i32>} : memref<1x4x8x8xbf16, #tpu.memory_space<vmem>>, vector<1x1x8x8xbf16>,
    %69 = vector.extract_strided_slice %9 {offsets = [0, 24], sizes = [8, 8], strides = [1, 1]} : vector<8x32xf32> to vector<8x8xf32>
    %70 = arith.truncf %69 : vector<8x8xf32> to vector<8x8xbf16>
    %c0_50 = arith.constant 0 : index
    %c3 = arith.constant 3 : index
    %c0_51 = arith.constant 0 : index
    %c0_52 = arith.constant 0 : index
    %71 = vector.load %arg9[%c0_50, %c3, %c0_51, %c0_52] : memref<1x4x8x8xbf16, #tpu.memory_space<vmem>>, vector<1x1x8x8xbf16>
    %72 = vector.shape_cast %71 : vector<1x1x8x8xbf16> to vector<8x8xbf16>
    %73 = vector.shape_cast %70 : vector<8x8xbf16> to vector<1x1x8x8xbf16>
    tpu.vector_store %arg9[%c0_50, %c3, %c0_51, %c0_52], %73 {strides = array<i32>} : memref<1x4x8x8xbf16, #tpu.memory_space<vmem>>, vector<1x1x8x8xbf16>,
    %74 = vector.extract_strided_slice %16 {offsets = [0, 24], sizes = [8, 8], strides = [1, 1]} : vector<8x32xf32> to vector<8x8xf32>
    %75 = arith.truncf %74 : vector<8x8xf32> to vector<8x8xbf16>
    %c0_53 = arith.constant 0 : index
    %c3_54 = arith.constant 3 : index
    %c0_55 = arith.constant 0 : index
    %c0_56 = arith.constant 0 : index
    %76 = vector.load %arg10[%c0_53, %c3_54, %c0_55, %c0_56] : memref<1x4x8x8xbf16, #tpu.memory_space<vmem>>, vector<1x1x8x8xbf16>
    %77 = vector.shape_cast %76 : vector<1x1x8x8xbf16> to vector<8x8xbf16>
    %78 = vector.shape_cast %75 : vector<8x8xbf16> to vector<1x1x8x8xbf16>
    tpu.vector_store %arg10[%c0_53, %c3_54, %c0_55, %c0_56], %78 {strides = array<i32>} : memref<1x4x8x8xbf16, #tpu.memory_space<vmem>>, vector<1x1x8x8xbf16>,
    %79 = vector.extract_strided_slice %23 {offsets = [0, 24], sizes = [8, 8], strides = [1, 1]} : vector<8x32xf32> to vector<8x8xf32>
    %80 = arith.truncf %79 : vector<8x8xf32> to vector<8x8xbf16>
    %c0_57 = arith.constant 0 : index
    %c3_58 = arith.constant 3 : index
    %c0_59 = arith.constant 0 : index
    %c0_60 = arith.constant 0 : index
    %81 = vector.load %arg11[%c0_57, %c3_58, %c0_59, %c0_60] : memref<1x4x8x8xbf16, #tpu.memory_space<vmem>>, vector<1x1x8x8xbf16>
    %82 = vector.shape_cast %81 : vector<1x1x8x8xbf16> to vector<8x8xbf16>
    %83 = vector.shape_cast %80 : vector<8x8xbf16> to vector<1x1x8x8xbf16>
    tpu.vector_store %arg11[%c0_57, %c3_58, %c0_59, %c0_60], %83 {strides = array<i32>} : memref<1x4x8x8xbf16, #tpu.memory_space<vmem>>, vector<1x1x8x8xbf16>,
    return
  }
  func.func @transform_0(%arg0: i32, %arg1: i32) -> (i32, i32, i32) {
    %c0_i32 = arith.constant 0 : i32
    %c0_i32_0 = arith.constant 0 : i32
    return %arg0, %arg1, %c0_i32 : i32, i32, i32
  }
  func.func @transform_1(%arg0: i32, %arg1: i32) -> (i32, i32) {
    %c0_i32 = arith.constant 0 : i32
    %c0_i32_0 = arith.constant 0 : i32
    %c0_i32_1 = arith.constant 0 : i32
    return %c0_i32, %c0_i32_0 : i32, i32
  }
  func.func @transform_2(%arg0: i32, %arg1: i32) -> (i32, i32) {
    %c0_i32 = arith.constant 0 : i32
    %c0_i32_0 = arith.constant 0 : i32
    %c0_i32_1 = arith.constant 0 : i32
    return %c0_i32, %c0_i32_0 : i32, i32
  }
  func.func @transform_3(%arg0: i32, %arg1: i32) -> (i32, i32) {
    %c0_i32 = arith.constant 0 : i32
    %c0_i32_0 = arith.constant 0 : i32
    %c0_i32_1 = arith.constant 0 : i32
    return %c0_i32, %c0_i32_0 : i32, i32
  }
  func.func @transform_4(%arg0: i32, %arg1: i32) -> (i32, i32) {
    %c0_i32 = arith.constant 0 : i32
    %c0_i32_0 = arith.constant 0 : i32
    %c0_i32_1 = arith.constant 0 : i32
    return %c0_i32, %c0_i32_0 : i32, i32
  }
  func.func @transform_5(%arg0: i32, %arg1: i32) -> (i32, i32) {
    %c0_i32 = arith.constant 0 : i32
    %c0_i32_0 = arith.constant 0 : i32
    %c0_i32_1 = arith.constant 0 : i32
    return %c0_i32, %c0_i32_0 : i32, i32
  }
  func.func @transform_6(%arg0: i32, %arg1: i32) -> (i32, i32) {
    %c0_i32 = arith.constant 0 : i32
    %c0_i32_0 = arith.constant 0 : i32
    %c0_i32_1 = arith.constant 0 : i32
    return %c0_i32, %c0_i32_0 : i32, i32
  }
  func.func @transform_7(%arg0: i32, %arg1: i32) -> (i32, i32, i32, i32) {
    %c0_i32 = arith.constant 0 : i32
    %c0_i32_0 = arith.constant 0 : i32
    %c0_i32_1 = arith.constant 0 : i32
    return %arg0, %c0_i32, %arg1, %c0_i32_0 : i32, i32, i32, i32
  }
  func.func @transform_8(%arg0: i32, %arg1: i32) -> (i32, i32, i32, i32) {
    %c0_i32 = arith.constant 0 : i32
    %c0_i32_0 = arith.constant 0 : i32
    %c0_i32_1 = arith.constant 0 : i32
    return %arg0, %c0_i32, %arg1, %c0_i32_0 : i32, i32, i32, i32
  }
  func.func @transform_9(%arg0: i32, %arg1: i32) -> (i32, i32, i32, i32) {
    %c0_i32 = arith.constant 0 : i32
    %c0_i32_0 = arith.constant 0 : i32
    %c0_i32_1 = arith.constant 0 : i32
    return %arg0, %c0_i32, %arg1, %c0_i32_0 : i32, i32, i32, i32
  }
}

module attributes {stable_mosaic.version = 11 : i64} {
  func.func @qkv_proj_kernel(%arg0: i32, %arg1: i32, %arg2: memref<1x8x32xf32, #tpu.memory_space<vmem>>, %arg3: memref<32x32xbf16, #tpu.memory_space<vmem>>, %arg4: memref<1x32xf32, #tpu.memory_space<vmem>>, %arg5: memref<32x32xbf16, #tpu.memory_space<vmem>>, %arg6: memref<1x32xf32, #tpu.memory_space<vmem>>, %arg7: memref<32x32xbf16, #tpu.memory_space<vmem>>, %arg8: memref<1x32xf32, #tpu.memory_space<vmem>>, %arg9: memref<1x4x8x8xbf16, #tpu.memory_space<vmem>>, %arg10: memref<1x4x8x8xbf16, #tpu.memory_space<vmem>>, %arg11: memref<1x4x8x8xbf16, #tpu.memory_space<vmem>>) attributes {dimension_semantics = [#tpu.dimension_semantics<parallel>, #tpu.dimension_semantics<parallel>], iteration_bounds = array<i64: 2, 1>, scalar_prefetch = 0 : i64, scratch_operands = 0 : i64, tpu.core_type = #tpu.core_type<tc>, window_params = [{transform_indices = @transform_0, window_bounds = array<i64: 1, 8, 32>}, {pipeline_mode = #tpu.pipeline_mode<synchronous>, transform_indices = @transform_1, window_bounds = array<i64: 32, 32>}, {pipeline_mode = #tpu.pipeline_mode<synchronous>, transform_indices = @transform_2, window_bounds = array<i64: 1, 32>}, {pipeline_mode = #tpu.pipeline_mode<synchronous>, transform_indices = @transform_3, window_bounds = array<i64: 32, 32>}, {pipeline_mode = #tpu.pipeline_mode<synchronous>, transform_indices = @transform_4, window_bounds = array<i64: 1, 32>}, {pipeline_mode = #tpu.pipeline_mode<synchronous>, transform_indices = @transform_5, window_bounds = array<i64: 32, 32>}, {pipeline_mode = #tpu.pipeline_mode<synchronous>, transform_indices = @transform_6, window_bounds = array<i64: 1, 32>}, {transform_indices = @transform_7, window_bounds = array<i64: 1, 4, 8, 8>}, {transform_indices = @transform_8, window_bounds = array<i64: 1, 4, 8, 8>}, {transform_indices = @transform_9, window_bounds = array<i64: 1, 4, 8, 8>}]} {
    %c0 = arith.constant 0 : index
    %c0_0 = arith.constant 0 : index
    %c0_1 = arith.constant 0 : index
    %0 = vector.load %arg2[%c0, %c0_0, %c0_1] : memref<1x8x32xf32, #tpu.memory_space<vmem>>, vector<1x8x32xf32>
    %1 = vector.shape_cast %0 : vector<1x8x32xf32> to vector<8x32xf32>
    %2 = arith.truncf %1 : vector<8x32xf32> to vector<8x32xbf16>
    %c0_2 = arith.constant 0 : index
    %c0_3 = arith.constant 0 : index
    %3 = vector.load %arg3[%c0_2, %c0_3] : memref<32x32xbf16, #tpu.memory_space<vmem>>, vector<32x32xbf16>
    %cst = arith.constant dense<0.000000e+00> : vector<8x32xf32>
    %4 = tpu.matmul %2, %3, %cst {dimension_numbers = #tpu.dot_dimension_numbers<[1], [0], [0], [1], [0, 0, 1, 1], [], []>} : vector<8x32xbf16>, vector<32x32xbf16>, vector<8x32xf32> -> vector<8x32xf32>
    %c0_4 = arith.constant 0 : index
    %c0_5 = arith.constant 0 : index
    %5 = vector.load %arg4[%c0_4, %c0_5] : memref<1x32xf32, #tpu.memory_space<vmem>>, vector<1x32xf32>
    %6 = vector.shape_cast %5 : vector<1x32xf32> to vector<32xf32>
    %7 = vector.shape_cast %6 : vector<32xf32> to vector<1x32xf32>
    %8 = vector.broadcast %7 : vector<1x32xf32> to vector<8x32xf32>
    %9 = arith.addf %4, %8 : vector<8x32xf32>
    %c0_6 = arith.constant 0 : index
    %c0_7 = arith.constant 0 : index
    %10 = vector.load %arg5[%c0_6, %c0_7] : memref<32x32xbf16, #tpu.memory_space<vmem>>, vector<32x32xbf16>
    %cst_8 = arith.constant dense<0.000000e+00> : vector<8x32xf32>
    %11 = tpu.matmul %2, %10, %cst_8 {dimension_numbers = #tpu.dot_dimension_numbers<[1], [0], [0], [1], [0, 0, 1, 1], [], []>} : vector<8x32xbf16>, vector<32x32xbf16>, vector<8x32xf32> -> vector<8x32xf32>
    %c0_9 = arith.constant 0 : index
    %c0_10 = arith.constant 0 : index
    %12 = vector.load %arg6[%c0_9, %c0_10] : memref<1x32xf32, #tpu.memory_space<vmem>>, vector<1x32xf32>
    %13 = vector.shape_cast %12 : vector<1x32xf32> to vector<32xf32>
    %14 = vector.shape_cast %13 : vector<32xf32> to vector<1x32xf32>
    %15 = vector.broadcast %14 : vector<1x32xf32> to vector<8x32xf32>
    %16 = arith.addf %11, %15 : vector<8x32xf32>
    %c0_11 = arith.constant 0 : index
    %c0_12 = arith.constant 0 : index
    %17 = vector.load %arg7[%c0_11, %c0_12] : memref<32x32xbf16, #tpu.memory_space<vmem>>, vector<32x32xbf16>
    %cst_13 = arith.constant dense<0.000000e+00> : vector<8x32xf32>
    %18 = tpu.matmul %2, %17, %cst_13 {dimension_numbers = #tpu.dot_dimension_numbers<[1], [0], [0], [1], [0, 0, 1, 1], [], []>} : vector<8x32xbf16>, vector<32x32xbf16>, vector<8x32xf32> -> vector<8x32xf32>
    %c0_14 = arith.constant 0 : index
    %c0_15 = arith.constant 0 : index
    %19 = vector.load %arg8[%c0_14, %c0_15] : memref<1x32xf32, #tpu.memory_space<vmem>>, vector<1x32xf32>
    %20 = vector.shape_cast %19 : vector<1x32xf32> to vector<32xf32>
    %21 = vector.shape_cast %20 : vector<32xf32> to vector<1x32xf32>
    %22 = vector.broadcast %21 : vector<1x32xf32> to vector<8x32xf32>
    %23 = arith.addf %18, %22 : vector<8x32xf32>
    %24 = vector.extract_strided_slice %9 {offsets = [0, 0], sizes = [8, 8], strides = [1, 1]} : vector<8x32xf32> to vector<8x8xf32>
    %25 = arith.truncf %24 : vector<8x8xf32> to vector<8x8xbf16>
    %c0_16 = arith.constant 0 : index
    %c0_17 = arith.constant 0 : index
    %c0_18 = arith.constant 0 : index
    %c0_19 = arith.constant 0 : index
    %26 = vector.load %arg9[%c0_16, %c0_17, %c0_18, %c0_19] : memref<1x4x8x8xbf16, #tpu.memory_space<vmem>>, vector<1x1x8x8xbf16>
    %27 = vector.shape_cast %26 : vector<1x1x8x8xbf16> to vector<8x8xbf16>
    %28 = vector.shape_cast %25 : vector<8x8xbf16> to vector<1x1x8x8xbf16>
    tpu.vector_store %arg9[%c0_16, %c0_17, %c0_18, %c0_19], %28 {strides = array<i32>} : memref<1x4x8x8xbf16, #tpu.memory_space<vmem>>, vector<1x1x8x8xbf16>,
    %29 = vector.extract_strided_slice %16 {offsets = [0, 0], sizes = [8, 8], strides = [1, 1]} : vector<8x32xf32> to vector<8x8xf32>
    %30 = arith.truncf %29 : vector<8x8xf32> to vector<8x8xbf16>
    %c0_20 = arith.constant 0 : index
    %c0_21 = arith.constant 0 : index
    %c0_22 = arith.constant 0 : index
    %c0_23 = arith.constant 0 : index
    %31 = vector.load %arg10[%c0_20, %c0_21, %c0_22, %c0_23] : memref<1x4x8x8xbf16, #tpu.memory_space<vmem>>, vector<1x1x8x8xbf16>
    %32 = vector.shape_cast %31 : vector<1x1x8x8xbf16> to vector<8x8xbf16>
    %33 = vector.shape_cast %30 : vector<8x8xbf16> to vector<1x1x8x8xbf16>
    tpu.vector_store %arg10[%c0_20, %c0_21, %c0_22, %c0_23], %33 {strides = array<i32>} : memref<1x4x8x8xbf16, #tpu.memory_space<vmem>>, vector<1x1x8x8xbf16>,
    %34 = vector.extract_strided_slice %23 {offsets = [0, 0], sizes = [8, 8], strides = [1, 1]} : vector<8x32xf32> to vector<8x8xf32>
    %35 = arith.truncf %34 : vector<8x8xf32> to vector<8x8xbf16>
    %c0_24 = arith.constant 0 : index
    %c0_25 = arith.constant 0 : index
    %c0_26 = arith.constant 0 : index
    %c0_27 = arith.constant 0 : index
    %36 = vector.load %arg11[%c0_24, %c0_25, %c0_26, %c0_27] : memref<1x4x8x8xbf16, #tpu.memory_space<vmem>>, vector<1x1x8x8xbf16>
    %37 = vector.shape_cast %36 : vector<1x1x8x8xbf16> to vector<8x8xbf16>
    %38 = vector.shape_cast %35 : vector<8x8xbf16> to vector<1x1x8x8xbf16>
    tpu.vector_store %arg11[%c0_24, %c0_25, %c0_26, %c0_27], %38 {strides = array<i32>} : memref<1x4x8x8xbf16, #tpu.memory_space<vmem>>, vector<1x1x8x8xbf16>,
    %39 = vector.extract_strided_slice %9 {offsets = [0, 8], sizes = [8, 8], strides = [1, 1]} : vector<8x32xf32> to vector<8x8xf32>
    %40 = arith.truncf %39 : vector<8x8xf32> to vector<8x8xbf16>
    %c0_28 = arith.constant 0 : index
    %c1 = arith.constant 1 : index
    %c0_29 = arith.constant 0 : index
    %c0_30 = arith.constant 0 : index
    %41 = vector.load %arg9[%c0_28, %c1, %c0_29, %c0_30] : memref<1x4x8x8xbf16, #tpu.memory_space<vmem>>, vector<1x1x8x8xbf16>
    %42 = vector.shape_cast %41 : vector<1x1x8x8xbf16> to vector<8x8xbf16>
    %43 = vector.shape_cast %40 : vector<8x8xbf16> to vector<1x1x8x8xbf16>
    tpu.vector_store %arg9[%c0_28, %c1, %c0_29, %c0_30], %43 {strides = array<i32>} : memref<1x4x8x8xbf16, #tpu.memory_space<vmem>>, vector<1x1x8x8xbf16>,
    %44 = vector.extract_strided_slice %16 {offsets = [0, 8], sizes = [8, 8], strides = [1, 1]} : vector<8x32xf32> to vector<8x8xf32>
    %45 = arith.truncf %44 : vector<8x8xf32> to vector<8x8xbf16>
    %c0_31 = arith.constant 0 : index
    %c1_32 = arith.constant 1 : index
    %c0_33 = arith.constant 0 : index
    %c0_34 = arith.constant 0 : index
    %46 = vector.load %arg10[%c0_31, %c1_32, %c0_33, %c0_34] : memref<1x4x8x8xbf16, #tpu.memory_space<vmem>>, vector<1x1x8x8xbf16>
    %47 = vector.shape_cast %46 : vector<1x1x8x8xbf16> to vector<8x8xbf16>
    %48 = vector.shape_cast %45 : vector<8x8xbf16> to vector<1x1x8x8xbf16>
    tpu.vector_store %arg10[%c0_31, %c1_32, %c0_33, %c0_34], %48 {strides = array<i32>} : memref<1x4x8x8xbf16, #tpu.memory_space<vmem>>, vector<1x1x8x8xbf16>,
    %49 = vector.extract_strided_slice %23 {offsets = [0, 8], sizes = [8, 8], strides = [1, 1]} : vector<8x32xf32> to vector<8x8xf32>
    %50 = arith.truncf %49 : vector<8x8xf32> to vector<8x8xbf16>
    %c0_35 = arith.constant 0 : index
    %c1_36 = arith.constant 1 : index
    %c0_37 = arith.constant 0 : index
    %c0_38 = arith.constant 0 : index
    %51 = vector.load %arg11[%c0_35, %c1_36, %c0_37, %c0_38] : memref<1x4x8x8xbf16, #tpu.memory_space<vmem>>, vector<1x1x8x8xbf16>
    %52 = vector.shape_cast %51 : vector<1x1x8x8xbf16> to vector<8x8xbf16>
    %53 = vector.shape_cast %50 : vector<8x8xbf16> to vector<1x1x8x8xbf16>
    tpu.vector_store %arg11[%c0_35, %c1_36, %c0_37, %c0_38], %53 {strides = array<i32>} : memref<1x4x8x8xbf16, #tpu.memory_space<vmem>>, vector<1x1x8x8xbf16>,
    %54 = vector.extract_strided_slice %9 {offsets = [0, 16], sizes = [8, 8], strides = [1, 1]} : vector<8x32xf32> to vector<8x8xf32>
    %55 = arith.truncf %54 : vector<8x8xf32> to vector<8x8xbf16>
    %c0_39 = arith.constant 0 : index
    %c2 = arith.constant 2 : index
    %c0_40 = arith.constant 0 : index
    %c0_41 = arith.constant 0 : index
    %56 = vector.load %arg9[%c0_39, %c2, %c0_40, %c0_41] : memref<1x4x8x8xbf16, #tpu.memory_space<vmem>>, vector<1x1x8x8xbf16>
    %57 = vector.shape_cast %56 : vector<1x1x8x8xbf16> to vector<8x8xbf16>
    %58 = vector.shape_cast %55 : vector<8x8xbf16> to vector<1x1x8x8xbf16>
    tpu.vector_store %arg9[%c0_39, %c2, %c0_40, %c0_41], %58 {strides = array<i32>} : memref<1x4x8x8xbf16, #tpu.memory_space<vmem>>, vector<1x1x8x8xbf16>,
    %59 = vector.extract_strided_slice %16 {offsets = [0, 16], sizes = [8, 8], strides = [1, 1]} : vector<8x32xf32> to vector<8x8xf32>
    %60 = arith.truncf %59 : vector<8x8xf32> to vector<8x8xbf16>
    %c0_42 = arith.constant 0 : index
    %c2_43 = arith.constant 2 : index
    %c0_44 = arith.constant 0 : index
    %c0_45 = arith.constant 0 : index
    %61 = vector.load %arg10[%c0_42, %c2_43, %c0_44, %c0_45] : memref<1x4x8x8xbf16, #tpu.memory_space<vmem>>, vector<1x1x8x8xbf16>
    %62 = vector.shape_cast %61 : vector<1x1x8x8xbf16> to vector<8x8xbf16>
    %63 = vector.shape_cast %60 : vector<8x8xbf16> to vector<1x1x8x8xbf16>
    tpu.vector_store %arg10[%c0_42, %c2_43, %c0_44, %c0_45], %63 {strides = array<i32>} : memref<1x4x8x8xbf16, #tpu.memory_space<vmem>>, vector<1x1x8x8xbf16>,
    %64 = vector.extract_strided_slice %23 {offsets = [0, 16], sizes = [8, 8], strides = [1, 1]} : vector<8x32xf32> to vector<8x8xf32>
    %65 = arith.truncf %64 : vector<8x8xf32> to vector<8x8xbf16>
    %c0_46 = arith.constant 0 : index
    %c2_47 = arith.constant 2 : index
    %c0_48 = arith.constant 0 : index
    %c0_49 = arith.constant 0 : index
    %66 = vector.load %arg11[%c0_46, %c2_47, %c0_48, %c0_49] : memref<1x4x8x8xbf16, #tpu.memory_space<vmem>>, vector<1x1x8x8xbf16>
    %67 = vector.shape_cast %66 : vector<1x1x8x8xbf16> to vector<8x8xbf16>
    %68 = vector.shape_cast %65 : vector<8x8xbf16> to vector<1x1x8x8xbf16>
    tpu.vector_store %arg11[%c0_46, %c2_47, %c0_48, %c0_49], %68 {strides = array<i32>} : memref<1x4x8x8xbf16, #tpu.memory_space<vmem>>, vector<1x1x8x8xbf16>,
    %69 = vector.extract_strided_slice %9 {offsets = [0, 24], sizes = [8, 8], strides = [1, 1]} : vector<8x32xf32> to vector<8x8xf32>
    %70 = arith.truncf %69 : vector<8x8xf32> to vector<8x8xbf16>
    %c0_50 = arith.constant 0 : index
    %c3 = arith.constant 3 : index
    %c0_51 = arith.constant 0 : index
    %c0_52 = arith.constant 0 : index
    %71 = vector.load %arg9[%c0_50, %c3, %c0_51, %c0_52] : memref<1x4x8x8xbf16, #tpu.memory_space<vmem>>, vector<1x1x8x8xbf16>
    %72 = vector.shape_cast %71 : vector<1x1x8x8xbf16> to vector<8x8xbf16>
    %73 = vector.shape_cast %70 : vector<8x8xbf16> to vector<1x1x8x8xbf16>
    tpu.vector_store %arg9[%c0_50, %c3, %c0_51, %c0_52], %73 {strides = array<i32>} : memref<1x4x8x8xbf16, #tpu.memory_space<vmem>>, vector<1x1x8x8xbf16>,
    %74 = vector.extract_strided_slice %16 {offsets = [0, 24], sizes = [8, 8], strides = [1, 1]} : vector<8x32xf32> to vector<8x8xf32>
    %75 = arith.truncf %74 : vector<8x8xf32> to vector<8x8xbf16>
    %c0_53 = arith.constant 0 : index
    %c3_54 = arith.constant 3 : index
    %c0_55 = arith.constant 0 : index
    %c0_56 = arith.constant 0 : index
    %76 = vector.load %arg10[%c0_53, %c3_54, %c0_55, %c0_56] : memref<1x4x8x8xbf16, #tpu.memory_space<vmem>>, vector<1x1x8x8xbf16>
    %77 = vector.shape_cast %76 : vector<1x1x8x8xbf16> to vector<8x8xbf16>
    %78 = vector.shape_cast %75 : vector<8x8xbf16> to vector<1x1x8x8xbf16>
    tpu.vector_store %arg10[%c0_53, %c3_54, %c0_55, %c0_56], %78 {strides = array<i32>} : memref<1x4x8x8xbf16, #tpu.memory_space<vmem>>, vector<1x1x8x8xbf16>,
    %79 = vector.extract_strided_slice %23 {offsets = [0, 24], sizes = [8, 8], strides = [1, 1]} : vector<8x32xf32> to vector<8x8xf32>
    %80 = arith.truncf %79 : vector<8x8xf32> to vector<8x8xbf16>
    %c0_57 = arith.constant 0 : index
    %c3_58 = arith.constant 3 : index
    %c0_59 = arith.constant 0 : index
    %c0_60 = arith.constant 0 : index
    %81 = vector.load %arg11[%c0_57, %c3_58, %c0_59, %c0_60] : memref<1x4x8x8xbf16, #tpu.memory_space<vmem>>, vector<1x1x8x8xbf16>
    %82 = vector.shape_cast %81 : vector<1x1x8x8xbf16> to vector<8x8xbf16>
    %83 = vector.shape_cast %80 : vector<8x8xbf16> to vector<1x1x8x8xbf16>
    tpu.vector_store %arg11[%c0_57, %c3_58, %c0_59, %c0_60], %83 {strides = array<i32>} : memref<1x4x8x8xbf16, #tpu.memory_space<vmem>>, vector<1x1x8x8xbf16>,
    return
  }
  func.func @transform_0(%arg0: i32, %arg1: i32) -> (i32, i32, i32) {
    %c0_i32 = arith.constant 0 : i32
    %c0_i32_0 = arith.constant 0 : i32
    return %arg0, %arg1, %c0_i32 : i32, i32, i32
  }
  func.func @transform_1(%arg0: i32, %arg1: i32) -> (i32, i32) {
    %c0_i32 = arith.constant 0 : i32
    %c0_i32_0 = arith.constant 0 : i32
    %c0_i32_1 = arith.constant 0 : i32
    return %c0_i32, %c0_i32_0 : i32, i32
  }
  func.func @transform_2(%arg0: i32, %arg1: i32) -> (i32, i32) {
    %c0_i32 = arith.constant 0 : i32
    %c0_i32_0 = arith.constant 0 : i32
    %c0_i32_1 = arith.constant 0 : i32
    return %c0_i32, %c0_i32_0 : i32, i32
  }
  func.func @transform_3(%arg0: i32, %arg1: i32) -> (i32, i32) {
    %c0_i32 = arith.constant 0 : i32
    %c0_i32_0 = arith.constant 0 : i32
    %c0_i32_1 = arith.constant 0 : i32
    return %c0_i32, %c0_i32_0 : i32, i32
  }
  func.func @transform_4(%arg0: i32, %arg1: i32) -> (i32, i32) {
    %c0_i32 = arith.constant 0 : i32
    %c0_i32_0 = arith.constant 0 : i32
    %c0_i32_1 = arith.constant 0 : i32
    return %c0_i32, %c0_i32_0 : i32, i32
  }
  func.func @transform_5(%arg0: i32, %arg1: i32) -> (i32, i32) {
    %c0_i32 = arith.constant 0 : i32
    %c0_i32_0 = arith.constant 0 : i32
    %c0_i32_1 = arith.constant 0 : i32
    return %c0_i32, %c0_i32_0 : i32, i32
  }
  func.func @transform_6(%arg0: i32, %arg1: i32) -> (i32, i32) {
    %c0_i32 = arith.constant 0 : i32
    %c0_i32_0 = arith.constant 0 : i32
    %c0_i32_1 = arith.constant 0 : i32
    return %c0_i32, %c0_i32_0 : i32, i32
  }
  func.func @transform_7(%arg0: i32, %arg1: i32) -> (i32, i32, i32, i32) {
    %c0_i32 = arith.constant 0 : i32
    %c0_i32_0 = arith.constant 0 : i32
    %c0_i32_1 = arith.constant 0 : i32
    return %arg0, %c0_i32, %arg1, %c0_i32_0 : i32, i32, i32, i32
  }
  func.func @transform_8(%arg0: i32, %arg1: i32) -> (i32, i32, i32, i32) {
    %c0_i32 = arith.constant 0 : i32
    %c0_i32_0 = arith.constant 0 : i32
    %c0_i32_1 = arith.constant 0 : i32
    return %arg0, %c0_i32, %arg1, %c0_i32_0 : i32, i32, i32, i32
  }
  func.func @transform_9(%arg0: i32, %arg1: i32) -> (i32, i32, i32, i32) {
    %c0_i32 = arith.constant 0 : i32
    %c0_i32_0 = arith.constant 0 : i32
    %c0_i32_1 = arith.constant 0 : i32
    return %arg0, %c0_i32, %arg1, %c0_i32_0 : i32, i32, i32, i32
  }
}

</mosaic_0001>

<bundles_post_ra>
// kernel: tpu_custom_call.1
= control target key start
LH: loop header
LB: loop body
LE: loop exit
PB: predicated region body
PF: predicated region fallthrough
CT: control target
= control target key end

     0   :  { %s1782_s0 = inlined_call_operand.hbm [shape: f32[2,8,32], index: 0, kind: input, shape index: {}]   ;;  %s1783_s1 = inlined_call_operand.hbm [shape: bf16[32,32], index: 1, kind: input, shape index: {}]   ;;  %s1784_s2 = inlined_call_operand.vmem [shape: f32[1,32], index: 2, kind: input, shape index: {}]   ;;  %s1785_s3 = inlined_call_operand.hbm [shape: bf16[32,32], index: 3, kind: input, shape index: {}]   ;;  %s1786_s4 = inlined_call_operand.vmem [shape: f32[1,32], index: 4, kind: input, shape index: {}]   ;;  %s1787_s5 = inlined_call_operand.vmem [shape: bf16[32,32], index: 5, kind: input, shape index: {}]   ;;  %s1788_s6 = inlined_call_operand.vmem [shape: f32[1,32], index: 6, kind: input, shape index: {}]   ;;  %s1789_s7 = inlined_call_operand.hbm [shape: bf16[2,4,8,8], index: 7, kind: output, shape index: {0}]   ;;  %s1790_s8 = inlined_call_operand.hbm [shape: bf16[2,4,8,8], index: 8, kind: output, shape index: {1}]   ;;  %s1791_s9 = inlined_call_operand.hbm [shape: bf16[2,4,8,8], index: 9, kind: output, shape index: {2}]  }
   0x1   :  { %1801 = sst [smem:[#allocation18_spill]] %s1791_s9 }
   0x2   :  { %15 = vsyncpa [#allocation3], 0 }
   0x3   :  { %17 = vsyncpa [#allocation3 + $0x1], 0 }
   0x4   :  { %18 = vsyncpa [#allocation6], 0 }
   0x5   :  { %19 = vsyncpa [#allocation4], 0 }
   0x6   :  { %21 = vsyncpa [#allocation4 + $0x1], 0 }
   0x7   :  { %22 = vsyncpa [#allocation10], 0 }
   0x8   :  { %24 = vsyncpa [#allocation10 + $0x1], 0  ;;  %s1396_s30 = smov 0   ;;  %s1398_s10 = smov 0  }
   0x9   :  { %s1400_s11 = smov 0   ;;  %s1402_s12 = smov 0  }
   0xa   :  { %s1404_s13 = smov 0   ;;  %s1406_s14 = smov 0  }
   0xb LB: > { %1802 = sst [smem:[#allocation16_spill]] %s1309_s30  ;;  %s1427_s15 = sadd.s32 4294967295, %s1329_s14   ;;  %s1329_s14 = sphi %s1406_s14, %s30_s14   ;;  %s1325_s13 = sphi %s1404_s13, %s1828_s13   ;;  %s1321_s12 = sphi %s1402_s12, %s1827_s12   ;;  %s1317_s11 = sphi %s1400_s11, %s1826_s11   ;;  %s1313_s10 = sphi %s1398_s10, %s1825_s10   ;;  %s1309_s30 = sphi %s1396_s30, %s1824_s30  }
   0xc   : > { %s1792_s16 = sadd.s32 4294967294, %s1329_s14   ;;  %p64_p0 = scmp.ne.s32.totalorder %s1313_s10, %s1309_s30 }
   0xd   : > { %p1793_p1 = scmp.eq.s32.totalorder %s1427_s15, 0  ;;  %p222_p3 = scmp.eq.s32.totalorder %s1792_s16, 1 }
   0xe   : > { %p902_p5 = scmp.ge.s32.totalorder %s1329_s14, 1  ;;  %p285_p7 = scmp.lt.s32.totalorder %s1329_s14, 3 }
   0xf   : > { %p1438_p4 = por %p1793_p1, %p64_p0  ;;  %p1443_p6 = por %p222_p3, %p64_p0 }
  0x10   : > { %p1448_p8 = pnand %p902_p5, %p285_p7  ;;  %s1331_s20 = smov [#allocation5]  }
  0x11   : > { %s1803_s17 = scalar_select %p1438_p4, 1, 0 }
  0x12   : > { %s1804_s18 = scalar_select %p1443_p6, 1, 0 }
  0x13   : > { %s297_s21 = sshll.u32 %s1331_s20, 4  ;;  %p1005_p9 = pneg %p1448_p8  ;;  %s1452_s21 = int_to_ptr.vmem [resolvable:$true] %s297_s21 }
  0x14   : > { %1805 = sst [smem:[#allocation17_spill]] %s1804_s18  ;;  %s1332_s23 = smov [#allocation7]  }
  0x15   : > { %p1459_p11 = pnand %p1005_p9, %p1793_p1  ;;  %s313_s24 = sshll.u32 %s1332_s23, 4  ;;  %s1463_s24 = int_to_ptr.vmem [resolvable:$true] %s313_s24 }
  0x16   : > { %s1097_s27 = scalar_lea.hbm %s1783_s1, 256 }
  0x17   : > { %p1098_p12 = scmp.ne.s32.totalorder %s1783_s1, %s1097_s27  ;;  %p1099_p13 = pneg %p1459_p11 }
  0x18   : > { %p1104_p5 = scmp.lt.u32.totalorder %s1097_s27, %s1783_s1 }
  0x19   : > { %p1100_p0 = pnand %p1099_p13, %p1098_p12 }
  0x1b   : > { %p1101_p3 = pneg %p1100_p0 }
  0x1d   : > { %p1106_p7 = pnand %p1104_p5, %p1101_p3 }
  0x1f   : > { %1109 = shalt.err (!%p1106_p7)
}
  0x20   : > { %s1110_s23 = scalar_lea.vmem %s1452_s21, 256  ;;  %p1118_p2 = scmp.lt.s32.totalorder %s1452_s21, %s1452_s21 }
  0x21   : > { %p1111_p9 = scmp.ne.s32.totalorder %s1452_s21, %s1110_s23  ;;  %p1119_p12 = scmp.lt.s32.totalorder %s1110_s23, %s1110_s23 }
  0x23   : > { %p1113_p10 = pnand %p1111_p9, %p1099_p13  ;;  %p1120_p0 = por %p1119_p12, %p1118_p2 }
  0x25   : > { %p1114_p1 = pneg %p1113_p10 }
  0x27   : > { %p1121_p6 = pnand %p1120_p0, %p1114_p1 }
  0x29   : > { %1124 = shalt.err (!%p1121_p6)
}
  0x2a   : > { %s1333_s16 = smov 64   ;;  %s1334_s25 = smov 4  }
  0x2b   : > { %1008 = dma.hbm_to_vmem [thread:$0]  (!%p1459_p11), %s1783_s1, 256, %s1452_s21, [#allocation6], %s1333_s16, %s1333_s16, %s1334_s25  }
  0x2c   : > { %s1125_s20 = scalar_lea.hbm %s1785_s3, 256 }
  0x2d   : > { %p1126_p2 = scmp.ne.s32.totalorder %s1785_s3, %s1125_s20  ;;  %p1132_p10 = scmp.lt.u32.totalorder %s1125_s20, %s1785_s3 }
  0x2f   : > { %p1128_p1 = pnand %p1126_p2, %p1099_p13 }
  0x31   : > { %p1129_p6 = pneg %p1128_p1 }
  0x33   : > { %p1134_p3 = pnand %p1132_p10, %p1129_p6 }
  0x35   : > { %1137 = shalt.err (!%p1134_p3)
}
  0x36   : > { %s1138_s21 = scalar_lea.vmem %s1463_s24, 256  ;;  %p1146_p12 = scmp.lt.s32.totalorder %s1463_s24, %s1463_s24 }
  0x37   : > { %p1139_p5 = scmp.ne.s32.totalorder %s1463_s24, %s1138_s21  ;;  %p1147_p0 = scmp.lt.s32.totalorder %s1138_s21, %s1138_s21 }
  0x39   : > { %p1141_p7 = pnand %p1139_p5, %p1099_p13  ;;  %p1148_p2 = por %p1147_p0, %p1146_p12 }
  0x3b   : > { %p1142_p9 = pneg %p1141_p7 }
  0x3d   : > { %p1149_p1 = pnand %p1148_p2, %p1142_p9 }
  0x3f   : > { %1152 = shalt.err (!%p1149_p1)
}
  0x40   : > { %1011 = dma.hbm_to_vmem [thread:$0]  (!%p1459_p11), %s1785_s3, 256, %s1463_s24, [#allocation6], %s1333_s16, %s1333_s16, %s1334_s25  }
  0x41   : > { %s42_s18 = sadd.s32 1, %s1325_s13  ;;  %s51_s26 = sadd.s32 1, %s1317_s11 }
  0x42   : > { %p44_p13 = scmp.ge.s32.totalorder %s42_s18, 2  ;;  %p58_p6 = scmp.ne.s32.totalorder %s1317_s11, %s1313_s10 }
  0x43   : > { %p59_p10 = scmp.eq.s32.totalorder %s1329_s14, 0  ;;  %p1028_p3 = scmp.lt.s32.totalorder %s1329_s14, 2 }
  0x44   : > { %s1830_s18 = smov (%p44_p13, %s42_s18), 0  ;;  %p1808_p7 = scmp.eq.s32.totalorder %s1427_s15, 1 }
  0x45   : > { %p60_p5 = por %p59_p10, %p58_p6  ;;  %s46_s27 = ssub.s32 %s1325_s13, %s1830_s18 }
  0x46   : > { %p1527_p9 = por %p1808_p7, %p58_p6  ;;  %s336_s28 = sand.u32 1, %s1317_s11  }
  0x47   : > { %p49_p12 = scmp.eq.s32.totalorder %s46_s27, 0  ;;  %s906_s24 = sshll.u32 %s336_s28, 3 }
  0x48   : > { %s1809_s22 = scalar_select %p1527_p9, 1, 0 }
  0x49   : > { %s907_s16 = sshll.u32 %s1325_s13, 7  ;;  %s340_s21 = scalar_lea.vmem [#allocation2], %s906_s24 }
  0x4a   : > { %s1536_s25 = scalar_select %p49_p12, %s1317_s11, %s51_s26  }
  0x4b   : > { %s1541_s23 = scalar_lea.hbm %s1782_s0, %s907_s16  ;;  %s348_s9 = sshll.u32 %s340_s21, 4  ;;  %s1549_s9 = int_to_ptr.vmem [resolvable:$true] %s348_s9 }
  0x4c   : > { %p1545_p11 = pnand %p1028_p3, %p60_p5  ;;  %s337_s26 = scalar_lea.sflag [#allocation3], %s336_s28 }
  0x4d   : > { %s1153_s27 = scalar_lea.hbm %s1541_s23, 128  ;;  %s1158_s29 = scalar_lea.hbm %s1782_s0, 256 }
  0x4e   : > { %p1154_p0 = scmp.ne.s32.totalorder %s1541_s23, %s1153_s27  ;;  %p1155_p2 = pneg %p1545_p11 }
  0x4f   : > { %p1159_p6 = scmp.lt.u32.totalorder %s1541_s23, %s1782_s0  ;;  %p1160_p10 = scmp.lt.u32.totalorder %s1158_s29, %s1153_s27 }
  0x50   : > { %p1156_p1 = pnand %p1155_p2, %p1154_p0  ;;  %p1162_p5 = scmp.lt.u32.totalorder %s1153_s27, %s1541_s23 }
  0x51   : > { %p1161_p3 = por %p1160_p10, %p1159_p6 }
  0x52   : > { %p1157_p13 = pneg %p1156_p1 }
  0x53   : > { %p1163_p7 = por %p1162_p5, %p1161_p3 }
  0x55   : > { %p1164_p12 = pnand %p1163_p7, %p1157_p13 }
  0x57   : > { %1167 = shalt.err (!%p1164_p12)
}
  0x58   : > { %s1168_s28 = scalar_lea.vmem %s1549_s9, 128  ;;  %s1335_s24 = smov [#allocation2]  }
  0x59   : > { %p1169_p0 = scmp.ne.s32.totalorder %s1549_s9, %s1168_s28  ;;  %s1173_s16 = sshll.u32 %s1335_s24, 4  ;;  %s1174_s16 = int_to_ptr.vmem [resolvable:$false] %s1173_s16 }
  0x5a   : > { %s1175_s20 = scalar_lea.vmem %s1174_s16, 256  ;;  %p1176_p4 = scmp.lt.s32.totalorder %s1549_s9, %s1174_s16 }
  0x5b   : > { %p1171_p1 = pnand %p1169_p0, %p1155_p2  ;;  %p1177_p6 = scmp.lt.s32.totalorder %s1175_s20, %s1168_s28 }
  0x5d   : > { %p1172_p9 = pneg %p1171_p1  ;;  %p1178_p10 = por %p1177_p6, %p1176_p4 }
  0x5f   : > { %p1179_p3 = pnand %p1178_p10, %p1172_p9 }
  0x61   : > { %1182 = shalt.err (!%p1179_p3)
}
  0x62   : > { %1015 = dma.hbm_to_vmem [thread:$0]  (!%p1545_p11), %s1541_s23, 128, %s1549_s9, %s337_s26  }
  0x63   : > { %357 = sbr.rel (%p1448_p8) target bundleno = 518 (0x206), region = 48  ;;  %s1579_s27 = sand.u32 (!%p1448_p8), 1, %s1313_s10  }
  0x64   : > { %s909_s29 = sshll.u32 (!%p1448_p8), %s1579_s27, 3  ;;  %s360_s21 = scalar_lea.sflag (!%p1448_p8), [#allocation3], %s1579_s27 }
  0x65   : > { %s363_s28 = scalar_lea.vmem (!%p1448_p8), [#allocation2], %s909_s29  ;;  %p1811_p4 = scmp.ne.s32.totalorder (!%p1448_p8), %s1803_s17, 0 }
  0x6a   : > { %1292 = dma.done.wait (%p1811_p4), %s360_s21, 128  }
  0x6b   : > { %1294 = vsyncadd (%p1811_p4), %s360_s21, 4294967168  ;;  %p1812_p9 = scmp.eq.s32.totalorder %s1427_s15, 0 }
  0x6d   : > { %1296 = dma.done.wait (%p1812_p9), [#allocation6], 512   ;;  %p1813_p11 = pmov %p1812_p9 }
  0x6e   : > { %v1336_v0 = vmov 0.0   ;;  %vm1337_vm0 = vmmov 0   ;;  %v1091_v1 = vld [vmem:[#allocation5] sm:$0xff]   ;;  %v1092_v2 = vld [vmem:[#allocation7] sm:$0xff]   ;;  %v1093_v3 = vld [vmem:[#allocation5 + $0x8] sm:$0xff]   ;;  %vm442_vm1 = vcmask 261120  }
  0x6f   : > { %1298 = vsyncadd (%p1813_p11), [#allocation6], 4294966784  ;;  %965 = vmatprep.subr.bf16.mxu0 %v1336_v0  ;;  %973 = vmatprep.subr.bf16.mxu1 %v1336_v0  ;;  %v1094_v4 = vld [vmem:[#allocation7 + $0x8] sm:$0xff]   ;;  %v1095_v7 = vld [vmem:[%s1787_s5] sm:$0xff]   ;;  %s1604_s24 = sshll.u32 %s1579_s27, 4  ;;  %vm613_vm2 = vcmask 60416  }
  0x70   : > { %969 = vmatprep.mubr.msk.bf16.mxu0 %vm1337_vm0, %v1336_v0  ;;  %977 = vmatprep.mubr.msk.bf16.mxu1 %vm1337_vm0, %v1336_v0  ;;  %v417_v5 = vld [vmem:[%s363_s28] sm:$0xff]  ;;  %s1610_s29 = scalar_lea.vmem [#allocation8], %s1604_s24  ;;  %s1615_s21 = scalar_lea.vmem [#allocation9], %s1604_s24 }
  0x71   : > { %966 = vmatpush3.bf16.msra.mxu0 %v1091_v1  ;;  %974 = vmatpush3.bf16.msra.mxu1 %v1092_v2  ;;  %v418_v6 = vpack.c.bf16 %v417_v5, %v417_v5  ;;  %v1096_v8 = vld [vmem:[%s1787_s5 + $0x8] sm:$0xff]   ;;  %v915_v9 = vld [vmem:[%s1784_s2] ss:$0 sm:$0xff]  ;;  %s1338_s28 = smov 104   ;;  %s1339_s17 = smov 120  }
  0x72   : > { %967 = vmatprep.subr.bf16.mxu0 %v1336_v0  ;;  %975 = vmatprep.subr.bf16.mxu1 %v1336_v0  ;;  %v919_v10 = vld [vmem:[%s1786_s4] ss:$0 sm:$0xff]  ;;  %s1340_s9 = smov 112   ;;  %s1623_s30 = scalar_lea.vmem [#allocation11], %s1604_s24 }
  0x73   : > { %v923_v23 = vld [vmem:[%s1788_s6] ss:$0 sm:$0xff]  ;;  %s715_s26 = sshll.u32 %s1615_s21, 4  ;;  %s678_s16 = sand.u32 1, %s1427_s15   ;;  %s1632_s26 = int_to_ptr.vmem [resolvable:$true] %s715_s26 }
  0x74   : > { %s1630_s20 = sshll.u32 %s1321_s12, 8  ;;  %s1648_s12 = scalar_lea.sflag [#allocation10], %s678_s16 }
  0x75   : > { %968 = vmatpush3.bf16.msra.mxu0 %v1093_v3  ;;  %976 = vmatpush3.bf16.msra.mxu1 %v1094_v4  ;;  %s1183_s15 = scalar_lea.vmem %s1632_s26, 256  ;;  %p1814_p2 = scmp.ne.s32.totalorder %s1809_s22, 0 }
  0x76   : > { %981 = vmatprep.subr.bf16.mxu0 %v1336_v0  ;;  %p1184_p8 = scmp.ne.s32.totalorder %s1632_s26, %s1183_s15  ;;  %s1341_s19 = smov [#allocation9]  }
  0x77   : > { %s1187_s23 = sshll.u32 %s1341_s19, 4  ;;  %s1188_s23 = int_to_ptr.vmem [resolvable:$false] %s1187_s23 }
  0x78   : > { %970 = vmatmul.mubr.msk.bf16.vlgmr.msra.gmra.mrb[0].mxu0 %vm442_vm1, %v418_v6  ;;  %978 = vmatmul.mubr.msk.bf16.vlgmr.msra.gmra.mrb[0].mxu1 %vm442_vm1, %v418_v6  ;;  %p1185_p13 = pnand %p1184_p8, %p1814_p2  ;;  %p1190_p7 = scmp.lt.s32.totalorder %s1632_s26, %s1188_s23 }
  0x79   : > { %982 = vmatpush3.bf16.msra.mxu0 %v1095_v7  ;;  %985 = vmatprep.mubr.msk.bf16.mxu0 %vm1337_vm0, %v1336_v0 }
  0x7a   : > { %983 = vmatprep.subr.bf16.mxu0 %v1336_v0  ;;  %p1186_p5 = pneg %p1185_p13 }
  0x7d   : > { %984 = vmatpush3.bf16.msra.mxu0 %v1096_v8 }
  0x80   : > { %986 = vmatmul.mubr.msk.bf16.vlgmr.msra.gmra.mrb[4].mxu0 %vm442_vm1, %v418_v6 }
 0x14b   : > { %v480_v11 = vpop.f32.mrb[0].mxu0  ;;  %v543_v13 = vpop.f32.mrb[0].mxu1 }
 0x14c   : > { %v481_v12 = vadd.f32 %v915_v9, %v480_v11  ;;  %v971_v14 = vpop.f32.mrb[1].mxu0  ;;  %v544_v15 = vadd.f32 %v919_v10, %v543_v13  ;;  %v979_v16 = vpop.f32.mrb[1].mxu1 }
 0x14d   : > { %v483_v17 = vpop.f32.mrb[2].mxu0  ;;  %v546_v19 = vpop.f32.mrb[2].mxu1 }
 0x14e   : > { %v612_v18 = vpack.c.bf16 %v481_v12, %v481_v12  ;;  %v972_v20 = vpop.f32.mrb[3].mxu0  ;;  %v615_v21 = vpack.c.bf16 %v544_v15, %v544_v15  ;;  %v980_v22 = vpop.f32.mrb[3].mxu1 }
 0x150   : > { %614 = vst.msk [vmem:[%s1610_s29] sm:$0xf] %vm613_vm2, %v612_v18  ;;  %616 = vst.msk [vmem:[%s1615_s21] sm:$0xf] %vm613_vm2, %v615_v21  ;;  %663 = vrot.lane.b32.xlu1 %v615_v21, %s1338_s28  ;;  %630 = vrot.lane.b32.xlu0 %v615_v21, %s1339_s17 }
 0x153   : > { %v606_v24 = vpop.f32.mrb[4].mxu0 }
 0x154   : > { %v607_v25 = vadd.f32 %v923_v23, %v606_v24  ;;  %v987_v26 = vpop.f32.mrb[5].mxu0  ;;  %648 = vrot.lane.b32.xlu0 %v615_v21, %s1340_s9  ;;  %622 = vrot.lane.b32.xlu1 %v612_v18, %s1339_s17 }
 0x155   : > { %v609_v27 = vpop.f32.mrb[6].mxu0 }
 0x156   : > { %v617_v28 = vpack.c.bf16 %v607_v25, %v607_v25  ;;  %v988_v29 = vpop.f32.mrb[7].mxu0 }
 0x158   : > { %618 = vst.msk [vmem:[%s1623_s30] sm:$0xf] %vm613_vm2, %v617_v28  ;;  %643 = vrot.lane.b32.xlu1 %v612_v18, %s1340_s9  ;;  %638 = vrot.lane.b32.xlu0 %v617_v28, %s1339_s17 }
 0x15c   : > { %658 = vrot.lane.b32.xlu1 %v612_v18, %s1338_s28  ;;  %653 = vrot.lane.b32.xlu0 %v617_v28, %s1340_s9  ;;  %s1189_s9 = scalar_lea.vmem %s1188_s23, 512 }
 0x15d   : > { %p1191_p12 = scmp.lt.s32.totalorder %s1189_s9, %s1183_s15 }
 0x15f   : > { %p1192_p0 = por %p1191_p12, %p1190_p7 }
 0x160   : > { %668 = vrot.lane.b32.xlu0 %v617_v28, %s1338_s28  ;;  %s1642_s28 = scalar_lea.hbm %s1790_s8, %s1630_s20 }
 0x161   : > { %p1193_p1 = pnand %p1192_p0, %p1186_p5 }
 0x1c2   : > { %v664_v30 = vpop.permute.xlu1 %663  ;;  %v631_v31 = vpop.permute.xlu0 %630 }
 0x1c3   : > { %937 = vst.msk [vmem:[%s1615_s21 + $0xc] sm:$0xf] %vm613_vm2, %v664_v30  ;;  %930 = vst.msk [vmem:[%s1615_s21 + $0x4] sm:$0xf] %vm613_vm2, %v631_v31 }
 0x1c6   : > { %v649_v32 = vpop.permute.xlu0 %648  ;;  %v623_v33 = vpop.permute.xlu1 %622 }
 0x1c7   : > { %934 = vst.msk [vmem:[%s1615_s21 + $0x8] sm:$0xf] %vm613_vm2, %v649_v32  ;;  %928 = vst.msk [vmem:[%s1610_s29 + $0x4] sm:$0xf] %vm613_vm2, %v623_v33 }
 0x1c8   : > { %1196 = shalt.err (!%p1193_p1)
}
 0x1c9   : > { %s1197_s21 = scalar_lea.hbm %s1642_s28, 256  ;;  %s1201_s17 = scalar_lea.hbm %s1790_s8, 512 }
 0x1ca   : > { %p1198_p6 = scmp.ne.s32.totalorder %s1642_s28, %s1197_s21  ;;  %p1202_p4 = scmp.lt.u32.totalorder %s1642_s28, %s1790_s8 }
 0x1cb   : > { %p1203_p9 = scmp.lt.u32.totalorder %s1201_s17, %s1197_s21  ;;  %p1205_p8 = scmp.lt.u32.totalorder %s1197_s21, %s1642_s28 }
 0x1cc   : > { %p1199_p10 = pnand %p1198_p6, %p1814_p2 }
 0x1cd   : > { %p1204_p11 = por %p1203_p9, %p1202_p4 }
 0x1ce   : > { %p1200_p3 = pneg %p1199_p10 }
 0x1cf   : > { %p1206_p13 = por %p1205_p8, %p1204_p11 }
 0x1d1   : > { %p1207_p5 = pnand %p1206_p13, %p1200_p3 }
 0x1d3   : > { %1210 = shalt.err (!%p1207_p5)
}
 0x1d4   : > { %s1799_s15 = smov 64   ;;  %s1343_s9 = smov 4   ;;  %v644_v34 = vpop.permute.xlu1 %643  ;;  %v639_v35 = vpop.permute.xlu0 %638 }
 0x1d5   : > { %1000 = dma.vmem_to_hbm [thread:$0]  (%p1814_p2), %s1632_s26, 256, %s1642_s28, %s1648_s12, %s1799_s15, %s1799_s15, %s1343_s9  }
 0x1d6   : > { %s698_s21 = sshll.u32 %s1610_s29, 4  ;;  %933 = vst.msk [vmem:[%s1610_s29 + $0x8] sm:$0xf] %vm613_vm2, %v644_v34  ;;  %932 = vst.msk [vmem:[%s1623_s30 + $0x4] sm:$0xf] %vm613_vm2, %v639_v35  ;;  %s1686_s17 = scalar_lea.hbm %s1789_s7, %s1630_s20  ;;  %s1680_s21 = int_to_ptr.vmem [resolvable:$true] %s698_s21 }
 0x1d7   : > { %s1211_s28 = scalar_lea.vmem %s1680_s21, 256  ;;  %s1344_s23 = smov [#allocation8]  }
 0x1d8   : > { %v659_v36 = vpop.permute.xlu1 %658  ;;  %v654_v37 = vpop.permute.xlu0 %653  ;;  %p1212_p7 = scmp.ne.s32.totalorder %s1680_s21, %s1211_s28  ;;  %s1215_s16 = sshll.u32 %s1344_s23, 4  ;;  %s1216_s16 = int_to_ptr.vmem [resolvable:$false] %s1215_s16 }
 0x1d9   : > { %936 = vst.msk [vmem:[%s1610_s29 + $0xc] sm:$0xf] %vm613_vm2, %v659_v36  ;;  %935 = vst.msk [vmem:[%s1623_s30 + $0x8] sm:$0xf] %vm613_vm2, %v654_v37  ;;  %s1217_s24 = scalar_lea.vmem %s1216_s16, 512  ;;  %p1218_p1 = scmp.lt.s32.totalorder %s1680_s21, %s1216_s16 }
 0x1da   : > { %p1213_p12 = pnand %p1212_p7, %p1814_p2  ;;  %p1219_p6 = scmp.lt.s32.totalorder %s1217_s24, %s1211_s28 }
 0x1dc   : > { %p1214_p0 = pneg %p1213_p12  ;;  %p1220_p10 = por %p1219_p6, %p1218_p1 }
 0x1de   : > { %p1221_p3 = pnand %p1220_p10, %p1214_p0 }
 0x1e0   : > { %1224 = shalt.err (!%p1221_p3)
}
 0x1e1   : > { %s1225_s29 = scalar_lea.hbm %s1686_s17, 256  ;;  %s1229_s23 = scalar_lea.hbm %s1789_s7, 512 }
 0x1e2   : > { %p1226_p4 = scmp.ne.s32.totalorder %s1686_s17, %s1225_s29  ;;  %p1230_p8 = scmp.lt.u32.totalorder %s1686_s17, %s1789_s7 }
 0x1e3   : > { %p1231_p13 = scmp.lt.u32.totalorder %s1229_s23, %s1225_s29  ;;  %p1233_p7 = scmp.lt.u32.totalorder %s1225_s29, %s1686_s17 }
 0x1e4   : > { %p1227_p9 = pnand %p1226_p4, %p1814_p2 }
 0x1e5   : > { %p1232_p5 = por %p1231_p13, %p1230_p8 }
 0x1e6   : > { %p1228_p11 = pneg %p1227_p9 }
 0x1e7   : > { %p1234_p12 = por %p1233_p7, %p1232_p5 }
 0x1e9   : > { %p1235_p0 = pnand %p1234_p12, %p1228_p11 }
 0x1eb   : > { %1238 = shalt.err (!%p1235_p0)
}
 0x1ec   : > { %s1815_s28 = smov 64   ;;  %s1816_s24 = scalar_lea.sflag [#allocation4], %s1579_s27  ;;  %v669_v38 = vpop.permute.xlu0 %668 }
 0x1ed   : > { %999 = dma.vmem_to_hbm [thread:$0]  (%p1814_p2), %s1680_s21, 256, %s1686_s17, %s1816_s24, %s1815_s28, %s1815_s28, %s1343_s9  }
 0x1ee   : > { %s1817_s15 = sshll.u32 %s1623_s30, 4  ;;  %s1818_s29 = sld [smem:[#allocation18_spill]]  ;;  %938 = vst.msk [vmem:[%s1623_s30 + $0xc] sm:$0xf] %vm613_vm2, %v669_v38  ;;  %s1722_s15 = int_to_ptr.vmem [resolvable:$true] %s1817_s15 }
 0x1ef   : > { %s1239_s27 = scalar_lea.vmem %s1722_s15, 256  ;;  %s1345_s21 = smov [#allocation11]  }
 0x1f0   : > { %p1240_p1 = scmp.ne.s32.totalorder %s1722_s15, %s1239_s27  ;;  %s1243_s17 = sshll.u32 %s1345_s21, 4  ;;  %s1244_s17 = int_to_ptr.vmem [resolvable:$false] %s1243_s17 }
 0x1f1   : > { %s1245_s16 = scalar_lea.vmem %s1244_s17, 512  ;;  %p1246_p3 = scmp.lt.s32.totalorder %s1722_s15, %s1244_s17 }
 0x1f2   : > { %p1241_p6 = pnand %p1240_p1, %p1814_p2  ;;  %p1247_p4 = scmp.lt.s32.totalorder %s1245_s16, %s1239_s27 }
 0x1f4   : > { %s1728_s23 = scalar_lea.hbm %s1818_s29, %s1630_s20  ;;  %p1242_p10 = pneg %p1241_p6 }
 0x1f5   : > { %p1248_p9 = por %p1247_p4, %p1246_p3 }
 0x1f7   : > { %p1249_p11 = pnand %p1248_p9, %p1242_p10 }
 0x1f9   : > { %1252 = shalt.err (!%p1249_p11)
}
 0x1fa   : > { %s1253_s30 = scalar_lea.hbm %s1728_s23, 256  ;;  %s1257_s19 = scalar_lea.hbm %s1818_s29, 512 }
 0x1fb   : > { %p1254_p8 = scmp.ne.s32.totalorder %s1728_s23, %s1253_s30  ;;  %p1258_p7 = scmp.lt.u32.totalorder %s1728_s23, %s1818_s29 }
 0x1fc   : > { %p1259_p12 = scmp.lt.u32.totalorder %s1257_s19, %s1253_s30  ;;  %p1261_p1 = scmp.lt.u32.totalorder %s1253_s30, %s1728_s23 }
 0x1fd   : > { %p1255_p13 = pnand %p1254_p8, %p1814_p2 }
 0x1fe   : > { %p1260_p0 = por %p1259_p12, %p1258_p7 }
 0x1ff   : > { %p1256_p5 = pneg %p1255_p13 }
 0x200   : > { %p1262_p6 = por %p1261_p1, %p1260_p0 }
 0x202   : > { %p1263_p10 = pnand %p1262_p6, %p1256_p5 }
 0x204   : > { %1266 = shalt.err (!%p1263_p10)
}
 0x205   : > { %1001 = dma.vmem_to_hbm [thread:$0]  (%p1814_p2), %s1722_s15, 256, %s1728_s23, %s1648_s12, %s1815_s28, %s1815_s28, %s1343_s9  }
 0x206 PF: > { %s1819_s27 = sld [smem:[#allocation16_spill]]  ;;  %s1820_s17 = sld [smem:[#allocation17_spill]] }
 0x207   : > { %p1822_p4 = scmp.ge.s32.totalorder %s1329_s14, 2 }
 0x20c   : > { %s747_s16 = sand.u32 1, %s1819_s27   ;;  %p1821_p3 = scmp.ne.s32.totalorder %s1820_s17, 0 }
 0x20d   : > { %s748_s30 = scalar_lea.sflag [#allocation4], %s747_s16 }
 0x20e   : > { %p1017_p9 = pnand %p1822_p4, %p1821_p3 }
 0x210   : > { %1300 = dma.done.wait (!%p1017_p9), %s748_s30, 256  }
 0x211   : > { %1302 = vsyncadd (!%p1017_p9), %s748_s30, 4294967040  ;;  %s1823_s22 = sadd.s32 4294967294, %s1329_s14  }
 0x212   : > { %s756_s20 = sand.u32 1, %s1823_s22  }
 0x213   : > { %s757_s24 = scalar_lea.sflag [#allocation10], %s756_s20 }
 0x214   : > { %1304 = dma.done.wait (!%p1017_p9), %s757_s24, 512  }
 0x215   : > { %1306 = vsyncadd (!%p1017_p9), %s757_s24, 4294966784  ;;  %s30_s14 = sadd.s32 1, %s1329_s14   ;;  %s1824_s30 = smov %s1313_s10 }
 0x216   : > { %p27_p2 = scmp.ge.s32.totalorder %s30_s14, 4   ;;  %s1825_s10 = smov %s1317_s11 }
 0x217   : > { %s1826_s11 = smov %s1536_s25  ;;  %s1827_s12 = smov %s1325_s13 }
 0x218   : > { %s1828_s13 = smov %s1830_s18  ;;  %29 = sbr.rel (!%p27_p2) target bundleno = 11 (0xb), region = 142 }
 0x21f   :  { %771 = vsyncpa [#allocation3], 1 }
 0x220   :  { %773 = vsyncpa [#allocation3 + $0x1], 1 }
 0x221   :  { %774 = vsyncpa [#allocation6], 1 }
 0x222   :  { %775 = vsyncpa [#allocation4], 1 }
 0x223   :  { %777 = vsyncpa [#allocation4 + $0x1], 1 }
 0x224   :  { %778 = vsyncpa [#allocation10], 1 }
 0x225   :  { %780 = vsyncpa [#allocation10 + $0x1], 1 }

// kernel: tpu_custom_call.1
= control target key start
LH: loop header
LB: loop body
LE: loop exit
PB: predicated region body
PF: predicated region fallthrough
CT: control target
= control target key end

     0   :  { %s1782_s0 = inlined_call_operand.hbm [shape: f32[2,8,32], index: 0, kind: input, shape index: {}]   ;;  %s1783_s1 = inlined_call_operand.hbm [shape: bf16[32,32], index: 1, kind: input, shape index: {}]   ;;  %s1784_s2 = inlined_call_operand.vmem [shape: f32[1,32], index: 2, kind: input, shape index: {}]   ;;  %s1785_s3 = inlined_call_operand.hbm [shape: bf16[32,32], index: 3, kind: input, shape index: {}]   ;;  %s1786_s4 = inlined_call_operand.vmem [shape: f32[1,32], index: 4, kind: input, shape index: {}]   ;;  %s1787_s5 = inlined_call_operand.vmem [shape: bf16[32,32], index: 5, kind: input, shape index: {}]   ;;  %s1788_s6 = inlined_call_operand.vmem [shape: f32[1,32], index: 6, kind: input, shape index: {}]   ;;  %s1789_s7 = inlined_call_operand.hbm [shape: bf16[2,4,8,8], index: 7, kind: output, shape index: {0}]   ;;  %s1790_s8 = inlined_call_operand.hbm [shape: bf16[2,4,8,8], index: 8, kind: output, shape index: {1}]   ;;  %s1791_s9 = inlined_call_operand.hbm [shape: bf16[2,4,8,8], index: 9, kind: output, shape index: {2}]  }
   0x1   :  { %1801 = sst [smem:[#allocation18_spill]] %s1791_s9 }
   0x2   :  { %15 = vsyncpa [#allocation3], 0 }
   0x3   :  { %17 = vsyncpa [#allocation3 + $0x1], 0 }
   0x4   :  { %18 = vsyncpa [#allocation6], 0 }
   0x5   :  { %19 = vsyncpa [#allocation4], 0 }
   0x6   :  { %21 = vsyncpa [#allocation4 + $0x1], 0 }
   0x7   :  { %22 = vsyncpa [#allocation10], 0 }
   0x8   :  { %24 = vsyncpa [#allocation10 + $0x1], 0  ;;  %s1396_s30 = smov 0   ;;  %s1398_s10 = smov 0  }
   0x9   :  { %s1400_s11 = smov 0   ;;  %s1402_s12 = smov 0  }
   0xa   :  { %s1404_s13 = smov 0   ;;  %s1406_s14 = smov 0  }
   0xb LB: > { %1802 = sst [smem:[#allocation16_spill]] %s1309_s30  ;;  %s1427_s15 = sadd.s32 4294967295, %s1329_s14   ;;  %s1329_s14 = sphi %s1406_s14, %s30_s14   ;;  %s1325_s13 = sphi %s1404_s13, %s1828_s13   ;;  %s1321_s12 = sphi %s1402_s12, %s1827_s12   ;;  %s1317_s11 = sphi %s1400_s11, %s1826_s11   ;;  %s1313_s10 = sphi %s1398_s10, %s1825_s10   ;;  %s1309_s30 = sphi %s1396_s30, %s1824_s30  }
   0xc   : > { %s1792_s16 = sadd.s32 4294967294, %s1329_s14   ;;  %p64_p0 = scmp.ne.s32.totalorder %s1313_s10, %s1309_s30 }
   0xd   : > { %p1793_p1 = scmp.eq.s32.totalorder %s1427_s15, 0  ;;  %p222_p3 = scmp.eq.s32.totalorder %s1792_s16, 1 }
   0xe   : > { %p902_p5 = scmp.ge.s32.totalorder %s1329_s14, 1  ;;  %p285_p7 = scmp.lt.s32.totalorder %s1329_s14, 3 }
   0xf   : > { %p1438_p4 = por %p1793_p1, %p64_p0  ;;  %p1443_p6 = por %p222_p3, %p64_p0 }
  0x10   : > { %p1448_p8 = pnand %p902_p5, %p285_p7  ;;  %s1331_s20 = smov [#allocation5]  }
  0x11   : > { %s1803_s17 = scalar_select %p1438_p4, 1, 0 }
  0x12   : > { %s1804_s18 = scalar_select %p1443_p6, 1, 0 }
  0x13   : > { %s297_s21 = sshll.u32 %s1331_s20, 4  ;;  %p1005_p9 = pneg %p1448_p8  ;;  %s1452_s21 = int_to_ptr.vmem [resolvable:$true] %s297_s21 }
  0x14   : > { %1805 = sst [smem:[#allocation17_spill]] %s1804_s18  ;;  %s1332_s23 = smov [#allocation7]  }
  0x15   : > { %p1459_p11 = pnand %p1005_p9, %p1793_p1  ;;  %s313_s24 = sshll.u32 %s1332_s23, 4  ;;  %s1463_s24 = int_to_ptr.vmem [resolvable:$true] %s313_s24 }
  0x16   : > { %s1097_s27 = scalar_lea.hbm %s1783_s1, 256 }
  0x17   : > { %p1098_p12 = scmp.ne.s32.totalorder %s1783_s1, %s1097_s27  ;;  %p1099_p13 = pneg %p1459_p11 }
  0x18   : > { %p1104_p5 = scmp.lt.u32.totalorder %s1097_s27, %s1783_s1 }
  0x19   : > { %p1100_p0 = pnand %p1099_p13, %p1098_p12 }
  0x1b   : > { %p1101_p3 = pneg %p1100_p0 }
  0x1d   : > { %p1106_p7 = pnand %p1104_p5, %p1101_p3 }
  0x1f   : > { %1109 = shalt.err (!%p1106_p7)
}
  0x20   : > { %s1110_s23 = scalar_lea.vmem %s1452_s21, 256  ;;  %p1118_p2 = scmp.lt.s32.totalorder %s1452_s21, %s1452_s21 }
  0x21   : > { %p1111_p9 = scmp.ne.s32.totalorder %s1452_s21, %s1110_s23  ;;  %p1119_p12 = scmp.lt.s32.totalorder %s1110_s23, %s1110_s23 }
  0x23   : > { %p1113_p10 = pnand %p1111_p9, %p1099_p13  ;;  %p1120_p0 = por %p1119_p12, %p1118_p2 }
  0x25   : > { %p1114_p1 = pneg %p1113_p10 }
  0x27   : > { %p1121_p6 = pnand %p1120_p0, %p1114_p1 }
  0x29   : > { %1124 = shalt.err (!%p1121_p6)
}
  0x2a   : > { %s1333_s16 = smov 64   ;;  %s1334_s25 = smov 4  }
  0x2b   : > { %1008 = dma.hbm_to_vmem [thread:$0]  (!%p1459_p11), %s1783_s1, 256, %s1452_s21, [#allocation6], %s1333_s16, %s1333_s16, %s1334_s25  }
  0x2c   : > { %s1125_s20 = scalar_lea.hbm %s1785_s3, 256 }
  0x2d   : > { %p1126_p2 = scmp.ne.s32.totalorder %s1785_s3, %s1125_s20  ;;  %p1132_p10 = scmp.lt.u32.totalorder %s1125_s20, %s1785_s3 }
  0x2f   : > { %p1128_p1 = pnand %p1126_p2, %p1099_p13 }
  0x31   : > { %p1129_p6 = pneg %p1128_p1 }
  0x33   : > { %p1134_p3 = pnand %p1132_p10, %p1129_p6 }
  0x35   : > { %1137 = shalt.err (!%p1134_p3)
}
  0x36   : > { %s1138_s21 = scalar_lea.vmem %s1463_s24, 256  ;;  %p1146_p12 = scmp.lt.s32.totalorder %s1463_s24, %s1463_s24 }
  0x37   : > { %p1139_p5 = scmp.ne.s32.totalorder %s1463_s24, %s1138_s21  ;;  %p1147_p0 = scmp.lt.s32.totalorder %s1138_s21, %s1138_s21 }
  0x39   : > { %p1141_p7 = pnand %p1139_p5, %p1099_p13  ;;  %p1148_p2 = por %p1147_p0, %p1146_p12 }
  0x3b   : > { %p1142_p9 = pneg %p1141_p7 }
  0x3d   : > { %p1149_p1 = pnand %p1148_p2, %p1142_p9 }
  0x3f   : > { %1152 = shalt.err (!%p1149_p1)
}
  0x40   : > { %1011 = dma.hbm_to_vmem [thread:$0]  (!%p1459_p11), %s1785_s3, 256, %s1463_s24, [#allocation6], %s1333_s16, %s1333_s16, %s1334_s25  }
  0x41   : > { %s42_s18 = sadd.s32 1, %s1325_s13  ;;  %s51_s26 = sadd.s32 1, %s1317_s11 }
  0x42   : > { %p44_p13 = scmp.ge.s32.totalorder %s42_s18, 2  ;;  %p58_p6 = scmp.ne.s32.totalorder %s1317_s11, %s1313_s10 }
  0x43   : > { %p59_p10 = scmp.eq.s32.totalorder %s1329_s14, 0  ;;  %p1028_p3 = scmp.lt.s32.totalorder %s1329_s14, 2 }
  0x44   : > { %s1830_s18 = smov (%p44_p13, %s42_s18), 0  ;;  %p1808_p7 = scmp.eq.s32.totalorder %s1427_s15, 1 }
  0x45   : > { %p60_p5 = por %p59_p10, %p58_p6  ;;  %s46_s27 = ssub.s32 %s1325_s13, %s1830_s18 }
  0x46   : > { %p1527_p9 = por %p1808_p7, %p58_p6  ;;  %s336_s28 = sand.u32 1, %s1317_s11  }
  0x47   : > { %p49_p12 = scmp.eq.s32.totalorder %s46_s27, 0  ;;  %s906_s24 = sshll.u32 %s336_s28, 3 }
  0x48   : > { %s1809_s22 = scalar_select %p1527_p9, 1, 0 }
  0x49   : > { %s907_s16 = sshll.u32 %s1325_s13, 7  ;;  %s340_s21 = scalar_lea.vmem [#allocation2], %s906_s24 }
  0x4a   : > { %s1536_s25 = scalar_select %p49_p12, %s1317_s11, %s51_s26  }
  0x4b   : > { %s1541_s23 = scalar_lea.hbm %s1782_s0, %s907_s16  ;;  %s348_s9 = sshll.u32 %s340_s21, 4  ;;  %s1549_s9 = int_to_ptr.vmem [resolvable:$true] %s348_s9 }
  0x4c   : > { %p1545_p11 = pnand %p1028_p3, %p60_p5  ;;  %s337_s26 = scalar_lea.sflag [#allocation3], %s336_s28 }
  0x4d   : > { %s1153_s27 = scalar_lea.hbm %s1541_s23, 128  ;;  %s1158_s29 = scalar_lea.hbm %s1782_s0, 256 }
  0x4e   : > { %p1154_p0 = scmp.ne.s32.totalorder %s1541_s23, %s1153_s27  ;;  %p1155_p2 = pneg %p1545_p11 }
  0x4f   : > { %p1159_p6 = scmp.lt.u32.totalorder %s1541_s23, %s1782_s0  ;;  %p1160_p10 = scmp.lt.u32.totalorder %s1158_s29, %s1153_s27 }
  0x50   : > { %p1156_p1 = pnand %p1155_p2, %p1154_p0  ;;  %p1162_p5 = scmp.lt.u32.totalorder %s1153_s27, %s1541_s23 }
  0x51   : > { %p1161_p3 = por %p1160_p10, %p1159_p6 }
  0x52   : > { %p1157_p13 = pneg %p1156_p1 }
  0x53   : > { %p1163_p7 = por %p1162_p5, %p1161_p3 }
  0x55   : > { %p1164_p12 = pnand %p1163_p7, %p1157_p13 }
  0x57   : > { %1167 = shalt.err (!%p1164_p12)
}
  0x58   : > { %s1168_s28 = scalar_lea.vmem %s1549_s9, 128  ;;  %s1335_s24 = smov [#allocation2]  }
  0x59   : > { %p1169_p0 = scmp.ne.s32.totalorder %s1549_s9, %s1168_s28  ;;  %s1173_s16 = sshll.u32 %s1335_s24, 4  ;;  %s1174_s16 = int_to_ptr.vmem [resolvable:$false] %s1173_s16 }
  0x5a   : > { %s1175_s20 = scalar_lea.vmem %s1174_s16, 256  ;;  %p1176_p4 = scmp.lt.s32.totalorder %s1549_s9, %s1174_s16 }
  0x5b   : > { %p1171_p1 = pnand %p1169_p0, %p1155_p2  ;;  %p1177_p6 = scmp.lt.s32.totalorder %s1175_s20, %s1168_s28 }
  0x5d   : > { %p1172_p9 = pneg %p1171_p1  ;;  %p1178_p10 = por %p1177_p6, %p1176_p4 }
  0x5f   : > { %p1179_p3 = pnand %p1178_p10, %p1172_p9 }
  0x61   : > { %1182 = shalt.err (!%p1179_p3)
}
  0x62   : > { %1015 = dma.hbm_to_vmem [thread:$0]  (!%p1545_p11), %s1541_s23, 128, %s1549_s9, %s337_s26  }
  0x63   : > { %357 = sbr.rel (%p1448_p8) target bundleno = 518 (0x206), region = 48  ;;  %s1579_s27 = sand.u32 (!%p1448_p8), 1, %s1313_s10  }
  0x64   : > { %s909_s29 = sshll.u32 (!%p1448_p8), %s1579_s27, 3  ;;  %s360_s21 = scalar_lea.sflag (!%p1448_p8), [#allocation3], %s1579_s27 }
  0x65   : > { %s363_s28 = scalar_lea.vmem (!%p1448_p8), [#allocation2], %s909_s29  ;;  %p1811_p4 = scmp.ne.s32.totalorder (!%p1448_p8), %s1803_s17, 0 }
  0x6a   : > { %1292 = dma.done.wait (%p1811_p4), %s360_s21, 128  }
  0x6b   : > { %1294 = vsyncadd (%p1811_p4), %s360_s21, 4294967168  ;;  %p1812_p9 = scmp.eq.s32.totalorder %s1427_s15, 0 }
  0x6d   : > { %1296 = dma.done.wait (%p1812_p9), [#allocation6], 512   ;;  %p1813_p11 = pmov %p1812_p9 }
  0x6e   : > { %v1336_v0 = vmov 0.0   ;;  %vm1337_vm0 = vmmov 0   ;;  %v1091_v1 = vld [vmem:[#allocation5] sm:$0xff]   ;;  %v1092_v2 = vld [vmem:[#allocation7] sm:$0xff]   ;;  %v1093_v3 = vld [vmem:[#allocation5 + $0x8] sm:$0xff]   ;;  %vm442_vm1 = vcmask 261120  }
  0x6f   : > { %1298 = vsyncadd (%p1813_p11), [#allocation6], 4294966784  ;;  %965 = vmatprep.subr.bf16.mxu0 %v1336_v0  ;;  %973 = vmatprep.subr.bf16.mxu1 %v1336_v0  ;;  %v1094_v4 = vld [vmem:[#allocation7 + $0x8] sm:$0xff]   ;;  %v1095_v7 = vld [vmem:[%s1787_s5] sm:$0xff]   ;;  %s1604_s24 = sshll.u32 %s1579_s27, 4  ;;  %vm613_vm2 = vcmask 60416  }
  0x70   : > { %969 = vmatprep.mubr.msk.bf16.mxu0 %vm1337_vm0, %v1336_v0  ;;  %977 = vmatprep.mubr.msk.bf16.mxu1 %vm1337_vm0, %v1336_v0  ;;  %v417_v5 = vld [vmem:[%s363_s28] sm:$0xff]  ;;  %s1610_s29 = scalar_lea.vmem [#allocation8], %s1604_s24  ;;  %s1615_s21 = scalar_lea.vmem [#allocation9], %s1604_s24 }
  0x71   : > { %966 = vmatpush3.bf16.msra.mxu0 %v1091_v1  ;;  %974 = vmatpush3.bf16.msra.mxu1 %v1092_v2  ;;  %v418_v6 = vpack.c.bf16 %v417_v5, %v417_v5  ;;  %v1096_v8 = vld [vmem:[%s1787_s5 + $0x8] sm:$0xff]   ;;  %v915_v9 = vld [vmem:[%s1784_s2] ss:$0 sm:$0xff]  ;;  %s1338_s28 = smov 104   ;;  %s1339_s17 = smov 120  }
  0x72   : > { %967 = vmatprep.subr.bf16.mxu0 %v1336_v0  ;;  %975 = vmatprep.subr.bf16.mxu1 %v1336_v0  ;;  %v919_v10 = vld [vmem:[%s1786_s4] ss:$0 sm:$0xff]  ;;  %s1340_s9 = smov 112   ;;  %s1623_s30 = scalar_lea.vmem [#allocation11], %s1604_s24 }
  0x73   : > { %v923_v23 = vld [vmem:[%s1788_s6] ss:$0 sm:$0xff]  ;;  %s715_s26 = sshll.u32 %s1615_s21, 4  ;;  %s678_s16 = sand.u32 1, %s1427_s15   ;;  %s1632_s26 = int_to_ptr.vmem [resolvable:$true] %s715_s26 }
  0x74   : > { %s1630_s20 = sshll.u32 %s1321_s12, 8  ;;  %s1648_s12 = scalar_lea.sflag [#allocation10], %s678_s16 }
  0x75   : > { %968 = vmatpush3.bf16.msra.mxu0 %v1093_v3  ;;  %976 = vmatpush3.bf16.msra.mxu1 %v1094_v4  ;;  %s1183_s15 = scalar_lea.vmem %s1632_s26, 256  ;;  %p1814_p2 = scmp.ne.s32.totalorder %s1809_s22, 0 }
  0x76   : > { %981 = vmatprep.subr.bf16.mxu0 %v1336_v0  ;;  %p1184_p8 = scmp.ne.s32.totalorder %s1632_s26, %s1183_s15  ;;  %s1341_s19 = smov [#allocation9]  }
  0x77   : > { %s1187_s23 = sshll.u32 %s1341_s19, 4  ;;  %s1188_s23 = int_to_ptr.vmem [resolvable:$false] %s1187_s23 }
  0x78   : > { %970 = vmatmul.mubr.msk.bf16.vlgmr.msra.gmra.mrb[0].mxu0 %vm442_vm1, %v418_v6  ;;  %978 = vmatmul.mubr.msk.bf16.vlgmr.msra.gmra.mrb[0].mxu1 %vm442_vm1, %v418_v6  ;;  %p1185_p13 = pnand %p1184_p8, %p1814_p2  ;;  %p1190_p7 = scmp.lt.s32.totalorder %s1632_s26, %s1188_s23 }
  0x79   : > { %982 = vmatpush3.bf16.msra.mxu0 %v1095_v7  ;;  %985 = vmatprep.mubr.msk.bf16.mxu0 %vm1337_vm0, %v1336_v0 }
  0x7a   : > { %983 = vmatprep.subr.bf16.mxu0 %v1336_v0  ;;  %p1186_p5 = pneg %p1185_p13 }
  0x7d   : > { %984 = vmatpush3.bf16.msra.mxu0 %v1096_v8 }
  0x80   : > { %986 = vmatmul.mubr.msk.bf16.vlgmr.msra.gmra.mrb[4].mxu0 %vm442_vm1, %v418_v6 }
 0x14b   : > { %v480_v11 = vpop.f32.mrb[0].mxu0  ;;  %v543_v13 = vpop.f32.mrb[0].mxu1 }
 0x14c   : > { %v481_v12 = vadd.f32 %v915_v9, %v480_v11  ;;  %v971_v14 = vpop.f32.mrb[1].mxu0  ;;  %v544_v15 = vadd.f32 %v919_v10, %v543_v13  ;;  %v979_v16 = vpop.f32.mrb[1].mxu1 }
 0x14d   : > { %v483_v17 = vpop.f32.mrb[2].mxu0  ;;  %v546_v19 = vpop.f32.mrb[2].mxu1 }
 0x14e   : > { %v612_v18 = vpack.c.bf16 %v481_v12, %v481_v12  ;;  %v972_v20 = vpop.f32.mrb[3].mxu0  ;;  %v615_v21 = vpack.c.bf16 %v544_v15, %v544_v15  ;;  %v980_v22 = vpop.f32.mrb[3].mxu1 }
 0x150   : > { %614 = vst.msk [vmem:[%s1610_s29] sm:$0xf] %vm613_vm2, %v612_v18  ;;  %616 = vst.msk [vmem:[%s1615_s21] sm:$0xf] %vm613_vm2, %v615_v21  ;;  %663 = vrot.lane.b32.xlu1 %v615_v21, %s1338_s28  ;;  %630 = vrot.lane.b32.xlu0 %v615_v21, %s1339_s17 }
 0x153   : > { %v606_v24 = vpop.f32.mrb[4].mxu0 }
 0x154   : > { %v607_v25 = vadd.f32 %v923_v23, %v606_v24  ;;  %v987_v26 = vpop.f32.mrb[5].mxu0  ;;  %648 = vrot.lane.b32.xlu0 %v615_v21, %s1340_s9  ;;  %622 = vrot.lane.b32.xlu1 %v612_v18, %s1339_s17 }
 0x155   : > { %v609_v27 = vpop.f32.mrb[6].mxu0 }
 0x156   : > { %v617_v28 = vpack.c.bf16 %v607_v25, %v607_v25  ;;  %v988_v29 = vpop.f32.mrb[7].mxu0 }
 0x158   : > { %618 = vst.msk [vmem:[%s1623_s30] sm:$0xf] %vm613_vm2, %v617_v28  ;;  %643 = vrot.lane.b32.xlu1 %v612_v18, %s1340_s9  ;;  %638 = vrot.lane.b32.xlu0 %v617_v28, %s1339_s17 }
 0x15c   : > { %658 = vrot.lane.b32.xlu1 %v612_v18, %s1338_s28  ;;  %653 = vrot.lane.b32.xlu0 %v617_v28, %s1340_s9  ;;  %s1189_s9 = scalar_lea.vmem %s1188_s23, 512 }
 0x15d   : > { %p1191_p12 = scmp.lt.s32.totalorder %s1189_s9, %s1183_s15 }
 0x15f   : > { %p1192_p0 = por %p1191_p12, %p1190_p7 }
 0x160   : > { %668 = vrot.lane.b32.xlu0 %v617_v28, %s1338_s28  ;;  %s1642_s28 = scalar_lea.hbm %s1790_s8, %s1630_s20 }
 0x161   : > { %p1193_p1 = pnand %p1192_p0, %p1186_p5 }
 0x1c2   : > { %v664_v30 = vpop.permute.xlu1 %663  ;;  %v631_v31 = vpop.permute.xlu0 %630 }
 0x1c3   : > { %937 = vst.msk [vmem:[%s1615_s21 + $0xc] sm:$0xf] %vm613_vm2, %v664_v30  ;;  %930 = vst.msk [vmem:[%s1615_s21 + $0x4] sm:$0xf] %vm613_vm2, %v631_v31 }
 0x1c6   : > { %v649_v32 = vpop.permute.xlu0 %648  ;;  %v623_v33 = vpop.permute.xlu1 %622 }
 0x1c7   : > { %934 = vst.msk [vmem:[%s1615_s21 + $0x8] sm:$0xf] %vm613_vm2, %v649_v32  ;;  %928 = vst.msk [vmem:[%s1610_s29 + $0x4] sm:$0xf] %vm613_vm2, %v623_v33 }
 0x1c8   : > { %1196 = shalt.err (!%p1193_p1)
}
 0x1c9   : > { %s1197_s21 = scalar_lea.hbm %s1642_s28, 256  ;;  %s1201_s17 = scalar_lea.hbm %s1790_s8, 512 }
 0x1ca   : > { %p1198_p6 = scmp.ne.s32.totalorder %s1642_s28, %s1197_s21  ;;  %p1202_p4 = scmp.lt.u32.totalorder %s1642_s28, %s1790_s8 }
 0x1cb   : > { %p1203_p9 = scmp.lt.u32.totalorder %s1201_s17, %s1197_s21  ;;  %p1205_p8 = scmp.lt.u32.totalorder %s1197_s21, %s1642_s28 }
 0x1cc   : > { %p1199_p10 = pnand %p1198_p6, %p1814_p2 }
 0x1cd   : > { %p1204_p11 = por %p1203_p9, %p1202_p4 }
 0x1ce   : > { %p1200_p3 = pneg %p1199_p10 }
 0x1cf   : > { %p1206_p13 = por %p1205_p8, %p1204_p11 }
 0x1d1   : > { %p1207_p5 = pnand %p1206_p13, %p1200_p3 }
 0x1d3   : > { %1210 = shalt.err (!%p1207_p5)
}
 0x1d4   : > { %s1799_s15 = smov 64   ;;  %s1343_s9 = smov 4   ;;  %v644_v34 = vpop.permute.xlu1 %643  ;;  %v639_v35 = vpop.permute.xlu0 %638 }
 0x1d5   : > { %1000 = dma.vmem_to_hbm [thread:$0]  (%p1814_p2), %s1632_s26, 256, %s1642_s28, %s1648_s12, %s1799_s15, %s1799_s15, %s1343_s9  }
 0x1d6   : > { %s698_s21 = sshll.u32 %s1610_s29, 4  ;;  %933 = vst.msk [vmem:[%s1610_s29 + $0x8] sm:$0xf] %vm613_vm2, %v644_v34  ;;  %932 = vst.msk [vmem:[%s1623_s30 + $0x4] sm:$0xf] %vm613_vm2, %v639_v35  ;;  %s1686_s17 = scalar_lea.hbm %s1789_s7, %s1630_s20  ;;  %s1680_s21 = int_to_ptr.vmem [resolvable:$true] %s698_s21 }
 0x1d7   : > { %s1211_s28 = scalar_lea.vmem %s1680_s21, 256  ;;  %s1344_s23 = smov [#allocation8]  }
 0x1d8   : > { %v659_v36 = vpop.permute.xlu1 %658  ;;  %v654_v37 = vpop.permute.xlu0 %653  ;;  %p1212_p7 = scmp.ne.s32.totalorder %s1680_s21, %s1211_s28  ;;  %s1215_s16 = sshll.u32 %s1344_s23, 4  ;;  %s1216_s16 = int_to_ptr.vmem [resolvable:$false] %s1215_s16 }
 0x1d9   : > { %936 = vst.msk [vmem:[%s1610_s29 + $0xc] sm:$0xf] %vm613_vm2, %v659_v36  ;;  %935 = vst.msk [vmem:[%s1623_s30 + $0x8] sm:$0xf] %vm613_vm2, %v654_v37  ;;  %s1217_s24 = scalar_lea.vmem %s1216_s16, 512  ;;  %p1218_p1 = scmp.lt.s32.totalorder %s1680_s21, %s1216_s16 }
 0x1da   : > { %p1213_p12 = pnand %p1212_p7, %p1814_p2  ;;  %p1219_p6 = scmp.lt.s32.totalorder %s1217_s24, %s1211_s28 }
 0x1dc   : > { %p1214_p0 = pneg %p1213_p12  ;;  %p1220_p10 = por %p1219_p6, %p1218_p1 }
 0x1de   : > { %p1221_p3 = pnand %p1220_p10, %p1214_p0 }
 0x1e0   : > { %1224 = shalt.err (!%p1221_p3)
}
 0x1e1   : > { %s1225_s29 = scalar_lea.hbm %s1686_s17, 256  ;;  %s1229_s23 = scalar_lea.hbm %s1789_s7, 512 }
 0x1e2   : > { %p1226_p4 = scmp.ne.s32.totalorder %s1686_s17, %s1225_s29  ;;  %p1230_p8 = scmp.lt.u32.totalorder %s1686_s17, %s1789_s7 }
 0x1e3   : > { %p1231_p13 = scmp.lt.u32.totalorder %s1229_s23, %s1225_s29  ;;  %p1233_p7 = scmp.lt.u32.totalorder %s1225_s29, %s1686_s17 }
 0x1e4   : > { %p1227_p9 = pnand %p1226_p4, %p1814_p2 }
 0x1e5   : > { %p1232_p5 = por %p1231_p13, %p1230_p8 }
 0x1e6   : > { %p1228_p11 = pneg %p1227_p9 }
 0x1e7   : > { %p1234_p12 = por %p1233_p7, %p1232_p5 }
 0x1e9   : > { %p1235_p0 = pnand %p1234_p12, %p1228_p11 }
 0x1eb   : > { %1238 = shalt.err (!%p1235_p0)
}
 0x1ec   : > { %s1815_s28 = smov 64   ;;  %s1816_s24 = scalar_lea.sflag [#allocation4], %s1579_s27  ;;  %v669_v38 = vpop.permute.xlu0 %668 }
 0x1ed   : > { %999 = dma.vmem_to_hbm [thread:$0]  (%p1814_p2), %s1680_s21, 256, %s1686_s17, %s1816_s24, %s1815_s28, %s1815_s28, %s1343_s9  }
 0x1ee   : > { %s1817_s15 = sshll.u32 %s1623_s30, 4  ;;  %s1818_s29 = sld [smem:[#allocation18_spill]]  ;;  %938 = vst.msk [vmem:[%s1623_s30 + $0xc] sm:$0xf] %vm613_vm2, %v669_v38  ;;  %s1722_s15 = int_to_ptr.vmem [resolvable:$true] %s1817_s15 }
 0x1ef   : > { %s1239_s27 = scalar_lea.vmem %s1722_s15, 256  ;;  %s1345_s21 = smov [#allocation11]  }
 0x1f0   : > { %p1240_p1 = scmp.ne.s32.totalorder %s1722_s15, %s1239_s27  ;;  %s1243_s17 = sshll.u32 %s1345_s21, 4  ;;  %s1244_s17 = int_to_ptr.vmem [resolvable:$false] %s1243_s17 }
 0x1f1   : > { %s1245_s16 = scalar_lea.vmem %s1244_s17, 512  ;;  %p1246_p3 = scmp.lt.s32.totalorder %s1722_s15, %s1244_s17 }
 0x1f2   : > { %p1241_p6 = pnand %p1240_p1, %p1814_p2  ;;  %p1247_p4 = scmp.lt.s32.totalorder %s1245_s16, %s1239_s27 }
 0x1f4   : > { %s1728_s23 = scalar_lea.hbm %s1818_s29, %s1630_s20  ;;  %p1242_p10 = pneg %p1241_p6 }
 0x1f5   : > { %p1248_p9 = por %p1247_p4, %p1246_p3 }
 0x1f7   : > { %p1249_p11 = pnand %p1248_p9, %p1242_p10 }
 0x1f9   : > { %1252 = shalt.err (!%p1249_p11)
}
 0x1fa   : > { %s1253_s30 = scalar_lea.hbm %s1728_s23, 256  ;;  %s1257_s19 = scalar_lea.hbm %s1818_s29, 512 }
 0x1fb   : > { %p1254_p8 = scmp.ne.s32.totalorder %s1728_s23, %s1253_s30  ;;  %p1258_p7 = scmp.lt.u32.totalorder %s1728_s23, %s1818_s29 }
 0x1fc   : > { %p1259_p12 = scmp.lt.u32.totalorder %s1257_s19, %s1253_s30  ;;  %p1261_p1 = scmp.lt.u32.totalorder %s1253_s30, %s1728_s23 }
 0x1fd   : > { %p1255_p13 = pnand %p1254_p8, %p1814_p2 }
 0x1fe   : > { %p1260_p0 = por %p1259_p12, %p1258_p7 }
 0x1ff   : > { %p1256_p5 = pneg %p1255_p13 }
 0x200   : > { %p1262_p6 = por %p1261_p1, %p1260_p0 }
 0x202   : > { %p1263_p10 = pnand %p1262_p6, %p1256_p5 }
 0x204   : > { %1266 = shalt.err (!%p1263_p10)
}
 0x205   : > { %1001 = dma.vmem_to_hbm [thread:$0]  (%p1814_p2), %s1722_s15, 256, %s1728_s23, %s1648_s12, %s1815_s28, %s1815_s28, %s1343_s9  }
 0x206 PF: > { %s1819_s27 = sld [smem:[#allocation16_spill]]  ;;  %s1820_s17 = sld [smem:[#allocation17_spill]] }
 0x207   : > { %p1822_p4 = scmp.ge.s32.totalorder %s1329_s14, 2 }
 0x20c   : > { %s747_s16 = sand.u32 1, %s1819_s27   ;;  %p1821_p3 = scmp.ne.s32.totalorder %s1820_s17, 0 }
 0x20d   : > { %s748_s30 = scalar_lea.sflag [#allocation4], %s747_s16 }
 0x20e   : > { %p1017_p9 = pnand %p1822_p4, %p1821_p3 }
 0x210   : > { %1300 = dma.done.wait (!%p1017_p9), %s748_s30, 256  }
 0x211   : > { %1302 = vsyncadd (!%p1017_p9), %s748_s30, 4294967040  ;;  %s1823_s22 = sadd.s32 4294967294, %s1329_s14  }
 0x212   : > { %s756_s20 = sand.u32 1, %s1823_s22  }
 0x213   : > { %s757_s24 = scalar_lea.sflag [#allocation10], %s756_s20 }
 0x214   : > { %1304 = dma.done.wait (!%p1017_p9), %s757_s24, 512  }
 0x215   : > { %1306 = vsyncadd (!%p1017_p9), %s757_s24, 4294966784  ;;  %s30_s14 = sadd.s32 1, %s1329_s14   ;;  %s1824_s30 = smov %s1313_s10 }
 0x216   : > { %p27_p2 = scmp.ge.s32.totalorder %s30_s14, 4   ;;  %s1825_s10 = smov %s1317_s11 }
 0x217   : > { %s1826_s11 = smov %s1536_s25  ;;  %s1827_s12 = smov %s1325_s13 }
 0x218   : > { %s1828_s13 = smov %s1830_s18  ;;  %29 = sbr.rel (!%p27_p2) target bundleno = 11 (0xb), region = 142 }
 0x21f   :  { %771 = vsyncpa [#allocation3], 1 }
 0x220   :  { %773 = vsyncpa [#allocation3 + $0x1], 1 }
 0x221   :  { %774 = vsyncpa [#allocation6], 1 }
 0x222   :  { %775 = vsyncpa [#allocation4], 1 }
 0x223   :  { %777 = vsyncpa [#allocation4 + $0x1], 1 }
 0x224   :  { %778 = vsyncpa [#allocation10], 1 }
 0x225   :  { %780 = vsyncpa [#allocation10 + $0x1], 1 }

</bundles_post_ra>
